<compile_context>
chip_gen: v7x
topology: tpu7x:2x2x1
jax: 0.10.0
libtpu: 0.0.40
codegen_flags: <defaults>
</compile_context>

<pallas_src>
import math
import functools

import jax
import jax.numpy as jnp
from jax import lax
from jax.experimental import pallas as pl
from jax.experimental.pallas import tpu as pltpu


def _round_up(n, m):
    return ((n + m - 1) // m) * m


def _choose_tile_h(H, Wp, Cinp, W, Coutp, p, budget_bytes=2 << 20):
    """Largest row-tile height whose f32 input (with halo) and output tiles fit
    a per-buffer budget, so double-buffered tiles stay well under the scoped
    VMEM limit on v5e/v6e/v7x."""
    bytes_per_row = max(Wp * Cinp, W * Coutp) * 4
    th = budget_bytes // bytes_per_row - 2 * p
    th = int(max(1, min(th, H)))
    if th < H and th > 8:
        th = (th // 8) * 8  # sublane-friendly row count when tiling
    return max(th, 1)


def _vmem_limit_bytes(in_tile, out_tile, w_bytes):
    # double-buffered in/out tiles + weights + generous headroom for
    # kernel-internal temporaries (shifted tap views, f32 accumulator).
    est = 2 * (in_tile + out_tile + w_bytes)
    return int(min(max(4 * est + (8 << 20), 32 << 20), 64 << 20))


def _modconv_kernel(x_ref, mod_ref, dem_ref, wdw_ref, wperm_ref, o_ref, *, K, TH, W):
    # x_ref    : (1, 1, TH+2p, W+2p, Cin)  spatially pre-padded NHWC row tile (halo included)
    # mod_ref  : (1, 1, Cin)   per-sample modulation  (scale * Linear(style))
    # dem_ref  : (1, 1, Cout)  per-sample demodulation factor
    # wdw_ref  : (K, K, Cin)   depthwise weights
    # wperm_ref: (Cin, Cout)   1x1 "permute" conv weights
    # o_ref    : (1, TH, W, Cout)
    mod = mod_ref[0, 0, :].astype(jnp.float32)          # (Cin,)
    dem = dem_ref[0, 0, :].astype(jnp.float32)          # (Cout,)
    wdw = wdw_ref[...].astype(jnp.float32)              # (K, K, Cin)
    wperm = wperm_ref[...].astype(jnp.float32)          # (Cin, Cout)

    # Fold per-sample modulation into the depthwise weights and demodulation
    # into the 1x1 weights: tiny K*K*Cin and Cin*Cout elementwise ops instead
    # of H*W-sized elementwise passes over the activations.
    wdw_m = wdw * mod[None, None, :]                    # (K, K, Cin)
    wpd = wperm * dem[None, :]                          # (Cin, Cout)

    cin = wperm.shape[0]
    cout = wperm.shape[1]

    xp = x_ref[...][0, 0].astype(jnp.float32)           # (TH+2p, W+2p, Cin)

    # Depthwise conv + 1x1 conv + (de)modulation as K*K MXU matmuls:
    #   y[p, o] = sum_{ky,kx} sum_c x_shift[p, c] * (mod*wdw[ky,kx])[c] * wperm[c,o] * dem[o]
    # All large work goes to the MXU; the per-tap weight build is only Cin*Cout.
    acc = jnp.zeros((TH * W, cout), jnp.float32)
    for ky in range(K):
        for kx in range(K):
            w_tap = wdw_m[ky, kx][:, None] * wpd        # (Cin, Cout)
            x_shift = xp[ky:ky + TH, kx:kx + W, :].reshape(TH * W, cin)
            acc = acc + jnp.dot(x_shift, w_tap,
                                preferred_element_type=jnp.float32)

    o_ref[0] = acc.reshape(TH, W, cout).astype(o_ref.dtype)


class ModulatedDWConv2dPallas:
    """JAX/Pallas re-implementation of ModulatedDWConv2d_v2.forward."""

    def __init__(self, channels_in, channels_out, style_dim, kernel_size,
                 demodulate=True, key=None):
        if key is None:
            key = jax.random.PRNGKey(0)
        k1, k2, k3 = jax.random.split(key, 3)
        self.channels_in = channels_in
        self.channels_out = channels_out
        self.kernel_size = kernel_size
        self.demodulate = demodulate
        self.scale = 1.0 / math.sqrt(channels_in * kernel_size ** 2)
        self.padding = kernel_size // 2

        # Deterministic synthetic parameters (shapes mirror the torch module).
        self.weight_dw = jax.random.normal(
            k1, (channels_in, 1, kernel_size, kernel_size), jnp.float32)
        self.weight_permute = jax.random.normal(
            k2, (channels_out, channels_in, 1, 1), jnp.float32)
        bound = 1.0 / math.sqrt(style_dim)
        self.mod_weight = jax.random.uniform(
            k3, (channels_in, style_dim), jnp.float32, -bound, bound)
        self.mod_bias = jnp.ones((channels_in,), jnp.float32)  # bias.data.fill_(1.0)

    def __call__(self, x, style, tile_h=None):
        # x: (B, Cin, H, W) NCHW float32;  style: (B, style_dim)
        B, Cin, H, W = x.shape
        K = self.kernel_size
        p = self.padding
        Cout = self.channels_out

        # --- glue: style path (tiny) ---
        style_lin = style @ self.mod_weight.T + self.mod_bias       # (B, Cin)
        mod = self.scale * style_lin                                # (B, Cin)

        if self.demodulate:
            # w = (weight_dw.transpose(0,1) * weight_permute) -> (Cout, Cin, K, K)
            w = (self.weight_dw[:, 0][None, :, :, :]
                 * self.weight_permute[:, :, 0, 0][:, :, None, None])
            sw = style_lin[:, None, :, None, None] * w[None]        # (B,Cout,Cin,K,K)
            demod = lax.rsqrt(jnp.sum(sw * sw, axis=(2, 3, 4)) + 1e-8)  # (B, Cout)
        else:
            demod = jnp.ones((B, Cout), jnp.float32)

        # --- lane-dense channel padding (multiples of 128) ---
        LANE = 128
        Cinp = _round_up(Cin, LANE)
        Coutp = _round_up(Cout, LANE)

        # --- spatial row tiling with halo ---
        Wp = W + 2 * p
        if tile_h is None:
            tile_h = _choose_tile_h(H, Wp, Cinp, W, Coutp, p)
        TH = int(min(tile_h, H))
        nTH = -(-H // TH)
        Hpad = nTH * TH

        # --- glue: layout + padding (layout plumbing, not compute) ---
        x_nhwc = jnp.transpose(x, (0, 2, 3, 1))                     # (B, H, W, Cin)
        x_nhwc = jnp.pad(x_nhwc,
                         ((0, 0), (0, Hpad - H), (0, 0), (0, Cinp - Cin)))
        x_sp = jnp.pad(x_nhwc, ((0, 0), (p, p), (p, p), (0, 0)))    # (B, Hpad+2p, Wp, Cinp)
        # Overlapping row windows (each tile carries a 2p-row halo). The small
        # halo duplication keeps BlockSpec auto-pipelining; a manual-DMA halo
        # (pl.ANY + make_async_copy) would avoid the duplicate HBM copy for
        # very large images.
        x_tiles = jnp.stack(
            [x_sp[:, t * TH: t * TH + TH + 2 * p] for t in range(nTH)], axis=1)
        # (B, nTH, TH+2p, Wp, Cinp)

        wdw = jnp.transpose(self.weight_dw[:, 0], (1, 2, 0))        # (K, K, Cin)
        wdw = jnp.pad(wdw, ((0, 0), (0, 0), (0, Cinp - Cin)))
        wperm = self.weight_permute[:, :, 0, 0].T                   # (Cin, Cout)
        wperm = jnp.pad(wperm, ((0, Cinp - Cin), (0, Coutp - Cout)))
        mod3 = jnp.pad(mod, ((0, 0), (0, Cinp - Cin)))[:, None, :]      # (B,1,Cinp)
        dem3 = jnp.pad(demod, ((0, 0), (0, Coutp - Cout)))[:, None, :]  # (B,1,Coutp)

        kernel = functools.partial(_modconv_kernel, K=K, TH=TH, W=W)

        in_tile_bytes = (TH + 2 * p) * Wp * Cinp * 4
        out_tile_bytes = TH * W * Coutp * 4
        w_bytes = (K * K * Cinp + Cinp * Coutp + Cinp + Coutp) * 4
        vmem_limit = _vmem_limit_bytes(in_tile_bytes, out_tile_bytes, w_bytes)

        out = pl.pallas_call(
            kernel,
            out_shape=jax.ShapeDtypeStruct((B, Hpad, W, Coutp), jnp.float32),
            grid_spec=pltpu.PrefetchScalarGridSpec(
                num_scalar_prefetch=0,
                grid=(B, nTH),
                in_specs=[
                    pl.BlockSpec((1, 1, TH + 2 * p, Wp, Cinp),
                                 lambda b, t: (b, t, 0, 0, 0)),
                    pl.BlockSpec((1, 1, Cinp), lambda b, t: (b, 0, 0)),
                    pl.BlockSpec((1, 1, Coutp), lambda b, t: (b, 0, 0)),
                    pl.BlockSpec((K, K, Cinp), lambda b, t: (0, 0, 0)),
                    pl.BlockSpec((Cinp, Coutp), lambda b, t: (0, 0)),
                ],
                out_specs=pl.BlockSpec((1, TH, W, Coutp),
                                       lambda b, t: (b, t, 0, 0)),
            ),
            compiler_params=pltpu.CompilerParams(
                dimension_semantics=("parallel", "parallel"),
                vmem_limit_bytes=vmem_limit),
        )(x_tiles, mod3, dem3, wdw, wperm)

        out = out[:, :H, :, :Cout]                                  # drop row/channel pads
        return jnp.transpose(out, (0, 3, 1, 2))                     # back to NCHW

    # pure-JAX reference (mirrors the torch forward) for validation
    def reference(self, x, style):
        B, Cin, H, W = x.shape
        style_lin = style @ self.mod_weight.T + self.mod_bias
        mod = self.scale * style_lin
        xm = x * mod[:, :, None, None]
        dw = lax.conv_general_dilated(
            xm, self.weight_dw, (1, 1),
            [(self.padding, self.padding), (self.padding, self.padding)],
            dimension_numbers=('NCHW', 'OIHW', 'NCHW'),
            feature_group_count=Cin)
        y = lax.conv_general_dilated(
            dw, self.weight_permute, (1, 1), 'VALID',
            dimension_numbers=('NCHW', 'OIHW', 'NCHW'))
        if self.demodulate:
            w = (self.weight_dw[:, 0][None, :, :, :]
                 * self.weight_permute[:, :, 0, 0][:, :, None, None])
            sw = style_lin[:, None, :, None, None] * w[None]
            demod = lax.rsqrt(jnp.sum(sw * sw, axis=(2, 3, 4)) + 1e-8)
            y = y * demod[:, :, None, None]
        return y


if __name__ == "__main__":
    B, Cin, Cout, H, W = 2, 4, 4, 16, 16
    style_dim, K = 8, 3

    key = jax.random.PRNGKey(0)
    kx_, ks_, kp_ = jax.random.split(key, 3)
    x = jax.random.normal(kx_, (B, Cin, H, W), jnp.float32)
    style = jax.random.normal(ks_, (B, style_dim), jnp.float32)

    module = ModulatedDWConv2dPallas(Cin, Cout, style_dim, K,
                                     demodulate=True, key=kp_)

    ref = jax.block_until_ready(module.reference(x, style))

    # Auto tile height (whole image per grid step at this small size).
    out = jax.block_until_ready(module(x, style))
    assert out.shape == (B, Cout, H, W)
    assert jnp.allclose(out, ref, atol=1e-4, rtol=1e-4), \
        f"max abs diff {jnp.max(jnp.abs(out - ref))}"

    # Forced row tiling (exercises the multi-tile / halo path).
    out_tiled = jax.block_until_ready(module(x, style, tile_h=8))
    assert jnp.allclose(out_tiled, ref, atol=1e-4, rtol=1e-4), \
        f"max abs diff {jnp.max(jnp.abs(out_tiled - ref))}"

    print("KERNEL_OK")
</pallas_src>

<mosaic_0001>
module attributes {stable_mosaic.version = 11 : i64} {
  func.func @_modconv_kernel(%arg0: i32, %arg1: i32, %arg2: memref<1x1x18x18x128xf32, #tpu.memory_space<vmem>>, %arg3: memref<1x1x128xf32, #tpu.memory_space<vmem>>, %arg4: memref<1x1x128xf32, #tpu.memory_space<vmem>>, %arg5: memref<3x3x128xf32, #tpu.memory_space<vmem>>, %arg6: memref<128x128xf32, #tpu.memory_space<vmem>>, %arg7: memref<1x16x16x128xf32, #tpu.memory_space<vmem>>) attributes {dimension_semantics = [#tpu.dimension_semantics<parallel>, #tpu.dimension_semantics<parallel>], iteration_bounds = array<i64: 2, 1>, scalar_prefetch = 0 : i64, scratch_operands = 0 : i64, tpu.core_type = #tpu.core_type<tc>, window_params = [{transform_indices = @transform_0, window_bounds = array<i64: 1, 1, 18, 18, 128>}, {transform_indices = @transform_1, window_bounds = array<i64: 1, 1, 128>}, {transform_indices = @transform_2, window_bounds = array<i64: 1, 1, 128>}, {pipeline_mode = #tpu.pipeline_mode<synchronous>, transform_indices = @transform_3, window_bounds = array<i64: 3, 3, 128>}, {pipeline_mode = #tpu.pipeline_mode<synchronous>, transform_indices = @transform_4, window_bounds = array<i64: 128, 128>}, {transform_indices = @transform_5, window_bounds = array<i64: 1, 16, 16, 128>}]} {
    %c0 = arith.constant 0 : index
    %c0_0 = arith.constant 0 : index
    %c0_1 = arith.constant 0 : index
    %0 = vector.load %arg3[%c0, %c0_0, %c0_1] : memref<1x1x128xf32, #tpu.memory_space<vmem>>, vector<1x1x128xf32>
    %1 = vector.shape_cast %0 : vector<1x1x128xf32> to vector<128xf32>
    %c0_2 = arith.constant 0 : index
    %c0_3 = arith.constant 0 : index
    %c0_4 = arith.constant 0 : index
    %2 = vector.load %arg4[%c0_2, %c0_3, %c0_4] : memref<1x1x128xf32, #tpu.memory_space<vmem>>, vector<1x1x128xf32>
    %3 = vector.shape_cast %2 : vector<1x1x128xf32> to vector<128xf32>
    %c0_5 = arith.constant 0 : index
    %c0_6 = arith.constant 0 : index
    %c0_7 = arith.constant 0 : index
    %4 = vector.load %arg5[%c0_5, %c0_6, %c0_7] : memref<3x3x128xf32, #tpu.memory_space<vmem>>, vector<3x3x128xf32>
    %c0_8 = arith.constant 0 : index
    %c0_9 = arith.constant 0 : index
    %5 = vector.load %arg6[%c0_8, %c0_9] : memref<128x128xf32, #tpu.memory_space<vmem>>, vector<128x128xf32>
    %6 = vector.shape_cast %1 : vector<128xf32> to vector<1x1x128xf32>
    %7 = vector.broadcast %6 : vector<1x1x128xf32> to vector<3x3x128xf32>
    %8 = arith.mulf %4, %7 : vector<3x3x128xf32>
    %9 = vector.shape_cast %3 : vector<128xf32> to vector<1x128xf32>
    %10 = vector.broadcast %9 : vector<1x128xf32> to vector<128x128xf32>
    %11 = arith.mulf %5, %10 : vector<128x128xf32>
    %c0_10 = arith.constant 0 : index
    %c0_11 = arith.constant 0 : index
    %c0_12 = arith.constant 0 : index
    %c0_13 = arith.constant 0 : index
    %c0_14 = arith.constant 0 : index
    %12 = vector.load %arg2[%c0_10, %c0_11, %c0_12, %c0_13, %c0_14] : memref<1x1x18x18x128xf32, #tpu.memory_space<vmem>>, vector<1x1x18x18x128xf32>
    %13 = vector.shape_cast %12 : vector<1x1x18x18x128xf32> to vector<18x18x128xf32>
    %cst = arith.constant 0.000000e+00 : f32
    %14 = vector.broadcast %cst : f32 to vector<256x128xf32>
    %15 = vector.extract_strided_slice %8 {offsets = [0, 0, 0], sizes = [1, 1, 128], strides = [1, 1, 1]} : vector<3x3x128xf32> to vector<1x1x128xf32>
    %16 = vector.shape_cast %15 : vector<1x1x128xf32> to vector<128xf32>
    %17 = vector.shape_cast %16 : vector<128xf32> to vector<128x1xf32>
    %18 = vector.broadcast %17 : vector<128x1xf32> to vector<128x128xf32>
    %19 = arith.mulf %18, %11 : vector<128x128xf32>
    %20 = vector.extract_strided_slice %13 {offsets = [0, 0, 0], sizes = [16, 16, 128], strides = [1, 1, 1]} : vector<18x18x128xf32> to vector<16x16x128xf32>
    %21 = vector.shape_cast %20 : vector<16x16x128xf32> to vector<256x128xf32>
    %cst_15 = arith.constant dense<0.000000e+00> : vector<256x128xf32>
    %22 = tpu.matmul %21, %19, %cst_15 {dimension_numbers = #tpu.dot_dimension_numbers<[1], [0], [0], [1], [0, 0, 1, 1], [], []>} : vector<256x128xf32>, vector<128x128xf32>, vector<256x128xf32> -> vector<256x128xf32>
    %23 = arith.addf %14, %22 : vector<256x128xf32>
    %24 = vector.extract_strided_slice %8 {offsets = [0, 1, 0], sizes = [1, 1, 128], strides = [1, 1, 1]} : vector<3x3x128xf32> to vector<1x1x128xf32>
    %25 = vector.shape_cast %24 : vector<1x1x128xf32> to vector<128xf32>
    %26 = vector.shape_cast %25 : vector<128xf32> to vector<128x1xf32>
    %27 = vector.broadcast %26 : vector<128x1xf32> to vector<128x128xf32>
    %28 = arith.mulf %27, %11 : vector<128x128xf32>
    %29 = vector.extract_strided_slice %13 {offsets = [0, 1, 0], sizes = [16, 16, 128], strides = [1, 1, 1]} : vector<18x18x128xf32> to vector<16x16x128xf32>
    %30 = vector.shape_cast %29 : vector<16x16x128xf32> to vector<256x128xf32>
    %cst_16 = arith.constant dense<0.000000e+00> : vector<256x128xf32>
    %31 = tpu.matmul %30, %28, %cst_16 {dimension_numbers = #tpu.dot_dimension_numbers<[1], [0], [0], [1], [0, 0, 1, 1], [], []>} : vector<256x128xf32>, vector<128x128xf32>, vector<256x128xf32> -> vector<256x128xf32>
    %32 = arith.addf %23, %31 : vector<256x128xf32>
    %33 = vector.extract_strided_slice %8 {offsets = [0, 2, 0], sizes = [1, 1, 128], strides = [1, 1, 1]} : vector<3x3x128xf32> to vector<1x1x128xf32>
    %34 = vector.shape_cast %33 : vector<1x1x128xf32> to vector<128xf32>
    %35 = vector.shape_cast %34 : vector<128xf32> to vector<128x1xf32>
    %36 = vector.broadcast %35 : vector<128x1xf32> to vector<128x128xf32>
    %37 = arith.mulf %36, %11 : vector<128x128xf32>
    %38 = vector.extract_strided_slice %13 {offsets = [0, 2, 0], sizes = [16, 16, 128], strides = [1, 1, 1]} : vector<18x18x128xf32> to vector<16x16x128xf32>
    %39 = vector.shape_cast %38 : vector<16x16x128xf32> to vector<256x128xf32>
    %cst_17 = arith.constant dense<0.000000e+00> : vector<256x128xf32>
    %40 = tpu.matmul %39, %37, %cst_17 {dimension_numbers = #tpu.dot_dimension_numbers<[1], [0], [0], [1], [0, 0, 1, 1], [], []>} : vector<256x128xf32>, vector<128x128xf32>, vector<256x128xf32> -> vector<256x128xf32>
    %41 = arith.addf %32, %40 : vector<256x128xf32>
    %42 = vector.extract_strided_slice %8 {offsets = [1, 0, 0], sizes = [1, 1, 128], strides = [1, 1, 1]} : vector<3x3x128xf32> to vector<1x1x128xf32>
    %43 = vector.shape_cast %42 : vector<1x1x128xf32> to vector<128xf32>
    %44 = vector.shape_cast %43 : vector<128xf32> to vector<128x1xf32>
    %45 = vector.broadcast %44 : vector<128x1xf32> to vector<128x128xf32>
    %46 = arith.mulf %45, %11 : vector<128x128xf32>
    %47 = vector.extract_strided_slice %13 {offsets = [1, 0, 0], sizes = [16, 16, 128], strides = [1, 1, 1]} : vector<18x18x128xf32> to vector<16x16x128xf32>
    %48 = vector.shape_cast %47 : vector<16x16x128xf32> to vector<256x128xf32>
    %cst_18 = arith.constant dense<0.000000e+00> : vector<256x128xf32>
    %49 = tpu.matmul %48, %46, %cst_18 {dimension_numbers = #tpu.dot_dimension_numbers<[1], [0], [0], [1], [0, 0, 1, 1], [], []>} : vector<256x128xf32>, vector<128x128xf32>, vector<256x128xf32> -> vector<256x128xf32>
    %50 = arith.addf %41, %49 : vector<256x128xf32>
    %51 = vector.extract_strided_slice %8 {offsets = [1, 1, 0], sizes = [1, 1, 128], strides = [1, 1, 1]} : vector<3x3x128xf32> to vector<1x1x128xf32>
    %52 = vector.shape_cast %51 : vector<1x1x128xf32> to vector<128xf32>
    %53 = vector.shape_cast %52 : vector<128xf32> to vector<128x1xf32>
    %54 = vector.broadcast %53 : vector<128x1xf32> to vector<128x128xf32>
    %55 = arith.mulf %54, %11 : vector<128x128xf32>
    %56 = vector.extract_strided_slice %13 {offsets = [1, 1, 0], sizes = [16, 16, 128], strides = [1, 1, 1]} : vector<18x18x128xf32> to vector<16x16x128xf32>
    %57 = vector.shape_cast %56 : vector<16x16x128xf32> to vector<256x128xf32>
    %cst_19 = arith.constant dense<0.000000e+00> : vector<256x128xf32>
    %58 = tpu.matmul %57, %55, %cst_19 {dimension_numbers = #tpu.dot_dimension_numbers<[1], [0], [0], [1], [0, 0, 1, 1], [], []>} : vector<256x128xf32>, vector<128x128xf32>, vector<256x128xf32> -> vector<256x128xf32>
    %59 = arith.addf %50, %58 : vector<256x128xf32>
    %60 = vector.extract_strided_slice %8 {offsets = [1, 2, 0], sizes = [1, 1, 128], strides = [1, 1, 1]} : vector<3x3x128xf32> to vector<1x1x128xf32>
    %61 = vector.shape_cast %60 : vector<1x1x128xf32> to vector<128xf32>
    %62 = vector.shape_cast %61 : vector<128xf32> to vector<128x1xf32>
    %63 = vector.broadcast %62 : vector<128x1xf32> to vector<128x128xf32>
    %64 = arith.mulf %63, %11 : vector<128x128xf32>
    %65 = vector.extract_strided_slice %13 {offsets = [1, 2, 0], sizes = [16, 16, 128], strides = [1, 1, 1]} : vector<18x18x128xf32> to vector<16x16x128xf32>
    %66 = vector.shape_cast %65 : vector<16x16x128xf32> to vector<256x128xf32>
    %cst_20 = arith.constant dense<0.000000e+00> : vector<256x128xf32>
    %67 = tpu.matmul %66, %64, %cst_20 {dimension_numbers = #tpu.dot_dimension_numbers<[1], [0], [0], [1], [0, 0, 1, 1], [], []>} : vector<256x128xf32>, vector<128x128xf32>, vector<256x128xf32> -> vector<256x128xf32>
    %68 = arith.addf %59, %67 : vector<256x128xf32>
    %69 = vector.extract_strided_slice %8 {offsets = [2, 0, 0], sizes = [1, 1, 128], strides = [1, 1, 1]} : vector<3x3x128xf32> to vector<1x1x128xf32>
    %70 = vector.shape_cast %69 : vector<1x1x128xf32> to vector<128xf32>
    %71 = vector.shape_cast %70 : vector<128xf32> to vector<128x1xf32>
    %72 = vector.broadcast %71 : vector<128x1xf32> to vector<128x128xf32>
    %73 = arith.mulf %72, %11 : vector<128x128xf32>
    %74 = vector.extract_strided_slice %13 {offsets = [2, 0, 0], sizes = [16, 16, 128], strides = [1, 1, 1]} : vector<18x18x128xf32> to vector<16x16x128xf32>
    %75 = vector.shape_cast %74 : vector<16x16x128xf32> to vector<256x128xf32>
    %cst_21 = arith.constant dense<0.000000e+00> : vector<256x128xf32>
    %76 = tpu.matmul %75, %73, %cst_21 {dimension_numbers = #tpu.dot_dimension_numbers<[1], [0], [0], [1], [0, 0, 1, 1], [], []>} : vector<256x128xf32>, vector<128x128xf32>, vector<256x128xf32> -> vector<256x128xf32>
    %77 = arith.addf %68, %76 : vector<256x128xf32>
    %78 = vector.extract_strided_slice %8 {offsets = [2, 1, 0], sizes = [1, 1, 128], strides = [1, 1, 1]} : vector<3x3x128xf32> to vector<1x1x128xf32>
    %79 = vector.shape_cast %78 : vector<1x1x128xf32> to vector<128xf32>
    %80 = vector.shape_cast %79 : vector<128xf32> to vector<128x1xf32>
    %81 = vector.broadcast %80 : vector<128x1xf32> to vector<128x128xf32>
    %82 = arith.mulf %81, %11 : vector<128x128xf32>
    %83 = vector.extract_strided_slice %13 {offsets = [2, 1, 0], sizes = [16, 16, 128], strides = [1, 1, 1]} : vector<18x18x128xf32> to vector<16x16x128xf32>
    %84 = vector.shape_cast %83 : vector<16x16x128xf32> to vector<256x128xf32>
    %cst_22 = arith.constant dense<0.000000e+00> : vector<256x128xf32>
    %85 = tpu.matmul %84, %82, %cst_22 {dimension_numbers = #tpu.dot_dimension_numbers<[1], [0], [0], [1], [0, 0, 1, 1], [], []>} : vector<256x128xf32>, vector<128x128xf32>, vector<256x128xf32> -> vector<256x128xf32>
    %86 = arith.addf %77, %85 : vector<256x128xf32>
    %87 = vector.extract_strided_slice %8 {offsets = [2, 2, 0], sizes = [1, 1, 128], strides = [1, 1, 1]} : vector<3x3x128xf32> to vector<1x1x128xf32>
    %88 = vector.shape_cast %87 : vector<1x1x128xf32> to vector<128xf32>
    %89 = vector.shape_cast %88 : vector<128xf32> to vector<128x1xf32>
    %90 = vector.broadcast %89 : vector<128x1xf32> to vector<128x128xf32>
    %91 = arith.mulf %90, %11 : vector<128x128xf32>
    %92 = vector.extract_strided_slice %13 {offsets = [2, 2, 0], sizes = [16, 16, 128], strides = [1, 1, 1]} : vector<18x18x128xf32> to vector<16x16x128xf32>
    %93 = vector.shape_cast %92 : vector<16x16x128xf32> to vector<256x128xf32>
    %cst_23 = arith.constant dense<0.000000e+00> : vector<256x128xf32>
    %94 = tpu.matmul %93, %91, %cst_23 {dimension_numbers = #tpu.dot_dimension_numbers<[1], [0], [0], [1], [0, 0, 1, 1], [], []>} : vector<256x128xf32>, vector<128x128xf32>, vector<256x128xf32> -> vector<256x128xf32>
    %95 = arith.addf %86, %94 : vector<256x128xf32>
    %96 = vector.shape_cast %95 : vector<256x128xf32> to vector<16x16x128xf32>
    %c0_24 = arith.constant 0 : index
    %c0_25 = arith.constant 0 : index
    %c0_26 = arith.constant 0 : index
    %c0_27 = arith.constant 0 : index
    %97 = vector.load %arg7[%c0_24, %c0_25, %c0_26, %c0_27] : memref<1x16x16x128xf32, #tpu.memory_space<vmem>>, vector<1x16x16x128xf32>
    %98 = vector.shape_cast %97 : vector<1x16x16x128xf32> to vector<16x16x128xf32>
    %99 = vector.shape_cast %96 : vector<16x16x128xf32> to vector<1x16x16x128xf32>
    tpu.vector_store %arg7[%c0_24, %c0_25, %c0_26, %c0_27], %99 {strides = array<i32>} : memref<1x16x16x128xf32, #tpu.memory_space<vmem>>, vector<1x16x16x128xf32>,
    return
  }
  func.func @transform_0(%arg0: i32, %arg1: i32) -> (i32, i32, i32, i32, i32) {
    %c0_i32 = arith.constant 0 : i32
    %c0_i32_0 = arith.constant 0 : i32
    %c0_i32_1 = arith.constant 0 : i32
    %c0_i32_2 = arith.constant 0 : i32
    return %arg0, %arg1, %c0_i32, %c0_i32_0, %c0_i32_1 : i32, i32, i32, i32, i32
  }
  func.func @transform_1(%arg0: i32, %arg1: i32) -> (i32, i32, i32) {
    %c0_i32 = arith.constant 0 : i32
    %c0_i32_0 = arith.constant 0 : i32
    %c0_i32_1 = arith.constant 0 : i32
    return %arg0, %c0_i32, %c0_i32_0 : i32, i32, i32
  }
  func.func @transform_2(%arg0: i32, %arg1: i32) -> (i32, i32, i32) {
    %c0_i32 = arith.constant 0 : i32
    %c0_i32_0 = arith.constant 0 : i32
    %c0_i32_1 = arith.constant 0 : i32
    return %arg0, %c0_i32, %c0_i32_0 : i32, i32, i32
  }
  func.func @transform_3(%arg0: i32, %arg1: i32) -> (i32, i32, i32) {
    %c0_i32 = arith.constant 0 : i32
    %c0_i32_0 = arith.constant 0 : i32
    %c0_i32_1 = arith.constant 0 : i32
    %c0_i32_2 = arith.constant 0 : i32
    return %c0_i32, %c0_i32_0, %c0_i32_1 : i32, i32, i32
  }
  func.func @transform_4(%arg0: i32, %arg1: i32) -> (i32, i32) {
    %c0_i32 = arith.constant 0 : i32
    %c0_i32_0 = arith.constant 0 : i32
    %c0_i32_1 = arith.constant 0 : i32
    return %c0_i32, %c0_i32_0 : i32, i32
  }
  func.func @transform_5(%arg0: i32, %arg1: i32) -> (i32, i32, i32, i32) {
    %c0_i32 = arith.constant 0 : i32
    %c0_i32_0 = arith.constant 0 : i32
    %c0_i32_1 = arith.constant 0 : i32
    return %arg0, %arg1, %c0_i32, %c0_i32_0 : i32, i32, i32, i32
  }
}

</mosaic_0001>

<bundles_post_ra>
// kernel: tpu_custom_call.1
= control target key start
LH: loop header
LB: loop body
LE: loop exit
PB: predicated region body
PF: predicated region fallthrough
CT: control target
= control target key end

     0   :  { %10 = vsyncpa [#allocation3], 0  ;;  %s7144_s0 = inlined_call_operand.vmem [shape: f32[2,1,18,18,128], index: 0, kind: input, shape index: {}]   ;;  %s7145_s1 = inlined_call_operand.vmem [shape: f32[2,1,128], index: 1, kind: input, shape index: {}]   ;;  %s7146_s2 = inlined_call_operand.vmem [shape: f32[2,1,128], index: 2, kind: input, shape index: {}]   ;;  %s7147_s3 = inlined_call_operand.vmem [shape: f32[3,3,128], index: 3, kind: input, shape index: {}]   ;;  %s7148_s4 = inlined_call_operand.vmem [shape: f32[128,128], index: 4, kind: input, shape index: {}]   ;;  %s7149_s5 = inlined_call_operand.hbm [shape: f32[2,16,16,128], index: 5, kind: output, shape index: {}]  }
   0x1   :  { %12 = vsyncpa [#allocation3 + $0x1], 0  ;;  %s5770_s18 = smov 0   ;;  %s5772_s19 = smov 0  }
   0x2   :  { %s5774_s20 = smov 0   ;;  %s5776_s21 = smov 0  }
   0x3   :  { %s5778_s22 = smov 0   ;;  %s5780_s23 = smov 0  }
   0x4 LB: > { %s3839_s24 = sadd.s32 4294967295, %s5735_s23   ;;  %s3840_s25 = sadd.s32 4294967294, %s5735_s23   ;;  %s5735_s23 = sphi %s5780_s23, %s18_s23   ;;  %s5731_s22 = sphi %s5778_s22, %s7437_s22   ;;  %s5727_s21 = sphi %s5776_s21, %s7436_s21   ;;  %s5723_s20 = sphi %s5774_s20, %s7435_s20   ;;  %s5719_s19 = sphi %s5772_s19, %s7434_s19   ;;  %s5715_s18 = sphi %s5770_s18, %s7433_s18  }
   0x5   : > { %s30_s26 = sadd.s32 1, %s5731_s22  ;;  %s161_s27 = sadd.s32 1, %s5723_s20 }
   0x6   : > { %p32_p0 = scmp.ge.s32.totalorder %s30_s26, 2  ;;  %p171_p1 = scmp.ne.s32.totalorder %s5723_s20, %s5719_s19 }
   0x7   : > { %p172_p2 = scmp.eq.s32.totalorder %s3839_s24, 1  ;;  %p177_p3 = scmp.ne.s32.totalorder %s5719_s19, %s5715_s18 }
   0x8   : > { %s7439_s26 = smov (%p32_p0, %s30_s26), 0  ;;  %p178_p5 = scmp.eq.s32.totalorder %s3840_s25, 1 }
   0x9   : > { %p5810_p4 = por %p172_p2, %p171_p1  ;;  %s156_s29 = ssub.s32 %s5731_s22, %s7439_s26 }
   0xa   : > { %p3843_p6 = scmp.ge.s32.totalorder %s5735_s23, 1  ;;  %p159_p7 = scmp.eq.s32.totalorder %s156_s29, 0 }
   0xb   : > { %p5817_p8 = por %p178_p5, %p177_p3  ;;  %p226_p9 = scmp.lt.s32.totalorder %s5735_s23, 3 }
   0xc   : > { %s5823_s6 = scalar_select %p159_p7, %s5723_s20, %s161_s27  }
   0xd   : > { %p227_p10 = pnand %p3843_p6, %p226_p9 }
   0xf   : > { %230 = sbr.rel (%p227_p10) target bundleno = 732 (0x2dc), region = 40 }
  0x16   : > { %p264_p11 = scmp.lt.s32.totalorder %s5727_s21, 1  ;;  %v386_v0 = vlaneseq  ;;  %v283_v2 = vld [vmem:[%s7147_s3 + $0x4] sm:$0x7]  ;;  %v282_v3 = vld [vmem:[%s7147_s3] sm:$0x7]  ;;  %vm600_vm0 = vcmask 1046528  }
  0x17   : > { %v285_v25 = vld [vmem:[%s7148_s4] sm:$0xff]  ;;  %v286_v26 = vld [vmem:[%s7148_s4 + $0x8] sm:$0xff]  ;;  %v288_v31 = vld [vmem:[%s7148_s4 + $0x18] sm:$0xff]  ;;  %vm1246_vm1 = vcmask 1045504   ;;  %s5737_s8 = smov [#allocation2]  }
  0x18   : > { %s5827_s7 = scalar_select %p264_p11, %s5727_s21, 1  ;;  %v5829_v1 = vshrl.u32 %v386_v0, 7  ;;  %v287_v32 = vld [vmem:[%s7148_s4 + $0x10] sm:$0xff]  ;;  %v284_v37 = vld [vmem:[%s7147_s3 + $0x8] sm:$0x7]  ;;  %v289_v50 = vld [vmem:[%s7148_s4 + $0x20] sm:$0xff] }
  0x19   : > { %v290_v49 = vld [vmem:[%s7148_s4 + $0x28] sm:$0xff]  ;;  %v292_v0 = vld [vmem:[%s7148_s4 + $0x38] sm:$0xff]  ;;  %s5661_s9 = sshll.u32 %s5737_s8, 4  ;;  %s5662_s9 = int_to_ptr.vmem [resolvable:$false] %s5661_s9 }
  0x1a   : > { %s275_s14 = scalar_lea.vmem %s7145_s1, %s5827_s7  ;;  %v5842_v4 = vsub.s32 1, %v5829_v1  ;;  %s5566_s15 = smul.u32 432, %s5827_s7  ;;  %v5884_v20 = vsub.s32 2, %v5829_v1  ;;  %v5890_v22 = vsub.s32 0, %v5829_v1  ;;  %v291_v1 = vld [vmem:[%s7148_s4 + $0x30] sm:$0xff] }
  0x1b   : > { %v5844_v5 = vld [vmem:[%s275_s14] ss:$0 sm:$0xff]  ;;  %s278_s29 = scalar_lea.vmem %s7146_s2, %s5827_s7  ;;  %s5663_s10 = scalar_lea.vmem %s5662_s9, 8192 }
  0x1c   : > { %v5847_v6 = vmul.f32 %v5844_v5, %v283_v2  ;;  %v5850_v7 = vmul.f32 %v5844_v5, %v282_v3  ;;  %s5860_s24 = scalar_lea.vmem %s7144_s0, %s5566_s15  ;;  %7275 = vst [vmem:[#allocation5_spill] sm:$0xff] %v5884_v20  ;;  %v5898_v24 = vld [vmem:[%s278_s29] ss:$0 sm:$0xff]  ;;  %v5934_v44 = vmul.f32 %v5844_v5, %v284_v37  ;;  %s3853_s15 = sshll.u32 %s5727_s21, 12 }
  0x1d   : > { %v332_v10 = vld [vmem:[%s5860_s24] sm:$0xff]  ;;  %v5864_v11 = vld [vmem:[%s5860_s24 + $0x8] sm:$0xff]  ;;  %v5867_v12 = vld [vmem:[%s5860_s24 + $0x18] sm:$0xff]  ;;  %v5907_v29 = vmul.f32 %v5898_v24, %v285_v25  ;;  %v5910_v30 = vmul.f32 %v5898_v24, %v286_v26  ;;  %v5919_v35 = vmul.f32 %v5898_v24, %v288_v31  ;;  %v5922_v36 = vmul.f32 %v5898_v24, %v287_v32  ;;  %s7090_s27 = scalar_lea.hbm %s7149_s5, %s3853_s15 }
  0x1e   : > { %v1959_v8 = vrot.slane %v5847_v6, %v5842_v4  ;;  %v472_v9 = vrot.slane %v5850_v7, %v5842_v4  ;;  %v601_v13 = vrot.slane %v332_v10, 1  ;;  %v602_v14 = vrot.slane %v5864_v11, 1  ;;  %v5871_v15 = vld [vmem:[%s5860_s24 + $0x20] sm:$0xff]  ;;  %7277 = vst [vmem:[#allocation7_spill] sm:$0xff] %v5934_v44  ;;  %v294_v26 = vld [vmem:[%s7148_s4 + $0x48] sm:$0xff] }
  0x1f   : > { %v606_v16 = vrot.slane %v5867_v12, 1  ;;  %v607_v17 = vrot.slane %v5871_v15, 1  ;;  %v2309_v21 = vrot.slane %v5847_v6, %v5884_v20  ;;  %v389_v23 = vrot.slane %v5850_v7, %v5890_v22 }
  0x20   : > { %1961 = vbcast.lane.b32.xlu1 %v1959_v8, 256  ;;  %474 = vbcast.lane.b32.xlu0 %v472_v9, 256  ;;  %v603_v18 = vsel %vm600_vm0, %v601_v13, %v602_v14  ;;  %v5948_v52 = vrot.slane %v5934_v44, %v5890_v22  ;;  %v5953_v57 = vmul.f32 %v5898_v24, %v290_v49 }
  0x21   : > { %4318 = vmatprep.mubr.f32.mxu1 %v603_v18  ;;  %v5881_v19 = vsel %vm600_vm0, %v606_v16, %v607_v17  ;;  %v5956_v58 = vmul.f32 %v5898_v24, %v289_v50  ;;  %v5977_v10 = vmul.f32 %v5898_v24, %v292_v0  ;;  %v5980_v13 = vmul.f32 %v5898_v24, %v291_v1  ;;  %v298_v0 = vld [vmem:[%s7148_s4 + $0x68] sm:$0xff]  ;;  %v297_v1 = vld [vmem:[%s7148_s4 + $0x60] sm:$0xff] }
  0x22   : > { %4638 = vmatprep.mubr.f32.mxu0 %v5881_v19  ;;  %v6001_v37 = vmul.f32 %v5898_v24, %v294_v26 }
  0x24   : > { %1965 = vbcast.lane.b32.xlu1 %v1959_v8, 264  ;;  %478 = vbcast.lane.b32.xlu0 %v472_v9, 264 }
  0x28   : > { %486 = vbcast.lane.b32.xlu1 %v472_v9, 280  ;;  %482 = vbcast.lane.b32.xlu0 %v472_v9, 272 }
  0x2c   : > { %1973 = vbcast.lane.b32.xlu1 %v1959_v8, 280  ;;  %1969 = vbcast.lane.b32.xlu0 %v1959_v8, 272 }
  0x30   : > { %494 = vbcast.lane.b32.xlu1 %v472_v9, 296  ;;  %490 = vbcast.lane.b32.xlu0 %v472_v9, 288 }
  0x34   : > { %1981 = vbcast.lane.b32.xlu1 %v1959_v8, 296  ;;  %1977 = vbcast.lane.b32.xlu0 %v1959_v8, 288 }
  0x38   : > { %502 = vbcast.lane.b32.xlu1 %v472_v9, 312  ;;  %498 = vbcast.lane.b32.xlu0 %v472_v9, 304 }
  0x3c   : > { %1989 = vbcast.lane.b32.xlu1 %v1959_v8, 312  ;;  %1985 = vbcast.lane.b32.xlu0 %v1959_v8, 304 }
  0x40   : > { %510 = vbcast.lane.b32.xlu1 %v472_v9, 328  ;;  %506 = vbcast.lane.b32.xlu0 %v472_v9, 320 }
  0x44   : > { %1997 = vbcast.lane.b32.xlu1 %v1959_v8, 328  ;;  %1993 = vbcast.lane.b32.xlu0 %v1959_v8, 320 }
  0x48   : > { %518 = vbcast.lane.b32.xlu1 %v472_v9, 344  ;;  %514 = vbcast.lane.b32.xlu0 %v472_v9, 336 }
  0x4c   : > { %2005 = vbcast.lane.b32.xlu1 %v1959_v8, 344  ;;  %2001 = vbcast.lane.b32.xlu0 %v1959_v8, 336 }
  0x50   : > { %526 = vbcast.lane.b32.xlu1 %v472_v9, 360  ;;  %522 = vbcast.lane.b32.xlu0 %v472_v9, 352 }
  0x54   : > { %2013 = vbcast.lane.b32.xlu1 %v1959_v8, 360  ;;  %2009 = vbcast.lane.b32.xlu0 %v1959_v8, 352 }
  0x58   : > { %534 = vbcast.lane.b32.xlu1 %v472_v9, 376  ;;  %530 = vbcast.lane.b32.xlu0 %v472_v9, 368 }
  0x5c   : > { %2021 = vbcast.lane.b32.xlu1 %v1959_v8, 376  ;;  %2017 = vbcast.lane.b32.xlu0 %v1959_v8, 368 }
  0x60   : > { %2315 = vbcast.lane.b32.xlu1 %v2309_v21, 264  ;;  %2311 = vbcast.lane.b32.xlu0 %v2309_v21, 256 }
  0x64   : > { %2323 = vbcast.lane.b32.xlu1 %v2309_v21, 280  ;;  %2319 = vbcast.lane.b32.xlu0 %v2309_v21, 272 }
  0x68   : > { %2331 = vbcast.lane.b32.xlu1 %v2309_v21, 296  ;;  %2327 = vbcast.lane.b32.xlu0 %v2309_v21, 288 }
  0x6c   : > { %2339 = vbcast.lane.b32.xlu1 %v2309_v21, 312  ;;  %2335 = vbcast.lane.b32.xlu0 %v2309_v21, 304 }
  0x70   : > { %2347 = vbcast.lane.b32.xlu1 %v2309_v21, 328  ;;  %2343 = vbcast.lane.b32.xlu0 %v2309_v21, 320 }
  0x74   : > { %2355 = vbcast.lane.b32.xlu1 %v2309_v21, 344  ;;  %2351 = vbcast.lane.b32.xlu0 %v2309_v21, 336 }
  0x78   : > { %2363 = vbcast.lane.b32.xlu1 %v2309_v21, 360  ;;  %2359 = vbcast.lane.b32.xlu0 %v2309_v21, 352 }
  0x7c   : > { %2371 = vbcast.lane.b32.xlu1 %v2309_v21, 376  ;;  %2367 = vbcast.lane.b32.xlu0 %v2309_v21, 368 }
  0x80   : > { %395 = vbcast.lane.b32.xlu1 %v389_v23, 264  ;;  %391 = vbcast.lane.b32.xlu0 %v389_v23, 256 }
  0x84   : > { %403 = vbcast.lane.b32.xlu1 %v389_v23, 280  ;;  %399 = vbcast.lane.b32.xlu0 %v389_v23, 272 }
  0x88   : > { %411 = vbcast.lane.b32.xlu1 %v389_v23, 296  ;;  %407 = vbcast.lane.b32.xlu0 %v389_v23, 288 }
  0x8c   : > { %419 = vbcast.lane.b32.xlu1 %v389_v23, 312  ;;  %415 = vbcast.lane.b32.xlu0 %v389_v23, 304 }
  0x90   : > { %427 = vbcast.lane.b32.xlu1 %v389_v23, 328  ;;  %423 = vbcast.lane.b32.xlu0 %v389_v23, 320 }
  0x92   : > { %v1962_v27 = vpop.permute.xlu1 %1961  ;;  %v475_v28 = vpop.permute.xlu0 %474 }
  0x93   : > { %v2023_v38 = vmul.f32 %v1962_v27, %v5907_v29  ;;  %v536_v39 = vmul.f32 %v475_v28, %v5907_v29  ;;  %v293_v27 = vld [vmem:[%s7148_s4 + $0x40] sm:$0xff] }
  0x94   : > { %435 = vbcast.lane.b32.xlu1 %v389_v23, 344  ;;  %431 = vbcast.lane.b32.xlu0 %v389_v23, 336 }
  0x96   : > { %v1966_v33 = vpop.permute.xlu1 %1965  ;;  %v479_v34 = vpop.permute.xlu0 %478 }
  0x97   : > { %v2024_v40 = vmul.f32 %v1966_v33, %v5910_v30  ;;  %v537_v41 = vmul.f32 %v479_v34, %v5910_v30 }
  0x98   : > { %443 = vbcast.lane.b32.xlu1 %v389_v23, 360  ;;  %439 = vbcast.lane.b32.xlu0 %v389_v23, 352 }
  0x99   : > { %v5931_v42 = vpack.c.bf16 %v2024_v40, %v2023_v38  ;;  %v5006_v43 = vpack.c.bf16 %v537_v41, %v536_v39  ;;  %v6004_v38 = vmul.f32 %v5898_v24, %v293_v27 }
  0x9a   : > { %v487_v45 = vpop.permute.xlu1 %486  ;;  %v483_v46 = vpop.permute.xlu0 %482 }
  0x9b   : > { %7276 = vst [vmem:[#allocation6_spill] sm:$0xff] %v5931_v42  ;;  %v539_v47 = vmul.f32 %v487_v45, %v5919_v35  ;;  %v538_v48 = vmul.f32 %v483_v46, %v5922_v36  ;;  %5007 = vmatprep.subr.bf16.mxu1 %v5006_v43  ;;  %5135 = vmatprep.subr.bf16.mxu0 %v5931_v42  ;;  %v296_v46 = vld [vmem:[%s7148_s4 + $0x58] sm:$0xff] }
  0x9c   : > { %5009 = vmatpush3.bf16.msra.mxu1 %v5006_v43  ;;  %5137 = vmatpush3.bf16.msra.mxu0 %v5931_v42  ;;  %v6264_v42 = vld [vmem:[%s5860_s24 + $0xd0] sm:$0x3] }
  0x9d   : > { %v5010_v51 = vpack.c.bf16 %v539_v47, %v538_v48  ;;  %451 = vbcast.lane.b32.xlu1 %v389_v23, 376  ;;  %447 = vbcast.lane.b32.xlu0 %v389_v23, 368  ;;  %v295_v47 = vld [vmem:[%s7148_s4 + $0x50] sm:$0xff] }
  0x9e   : > { %v1974_v53 = vpop.permute.xlu1 %1973  ;;  %v1970_v54 = vpop.permute.xlu0 %1969 }
  0x9f   : > { %v2026_v55 = vmul.f32 %v1974_v53, %v5919_v35  ;;  %v2025_v56 = vmul.f32 %v1970_v54, %v5922_v36  ;;  %5011 = vmatprep.subr.bf16.mxu1 %v5010_v51  ;;  %v6025_v54 = vmul.f32 %v5898_v24, %v296_v46 }
  0xa0   : > { %5013 = vmatpush3.bf16.msra.mxu1 %v5010_v51 }
  0xa1   : > { %v5958_v59 = vpack.c.bf16 %v2026_v55, %v2025_v56  ;;  %2662 = vbcast.lane.b32.xlu1 %v5948_v52, 264  ;;  %2658 = vbcast.lane.b32.xlu0 %v5948_v52, 256  ;;  %v6028_v55 = vmul.f32 %v5898_v24, %v295_v47  ;;  %v334_v47 = vld [vmem:[%s5860_s24 + $0x10] sm:$0x3] }
  0xa2   : > { %v495_v60 = vpop.permute.xlu1 %494  ;;  %v491_v61 = vpop.permute.xlu0 %490 }
  0xa3   : > { %7278 = vst [vmem:[#allocation8_spill] sm:$0xff] %v5958_v59  ;;  %v541_v62 = vmul.f32 %v495_v60, %v5953_v57  ;;  %v540_v63 = vmul.f32 %v491_v61, %v5956_v58  ;;  %5139 = vmatprep.subr.bf16.mxu0 %v5958_v59 }
  0xa4   : > { %5141 = vmatpush3.bf16.msra.mxu0 %v5958_v59  ;;  %v6254_v59 = vld [vmem:[%s5860_s24 + $0xc8] sm:$0xff] }
  0xa5   : > { %v5014_v2 = vpack.c.bf16 %v541_v62, %v540_v63  ;;  %2670 = vbcast.lane.b32.xlu1 %v5948_v52, 280  ;;  %2666 = vbcast.lane.b32.xlu0 %v5948_v52, 272 }
  0xa6   : > { %v1982_v3 = vpop.permute.xlu1 %1981  ;;  %v1978_v5 = vpop.permute.xlu0 %1977 }
  0xa7   : > { %v2028_v8 = vmul.f32 %v1982_v3, %v5953_v57  ;;  %v2027_v9 = vmul.f32 %v1978_v5, %v5956_v58  ;;  %5015 = vmatprep.subr.bf16.mxu1 %v5014_v2  ;;  %v6048_v3 = vrot.slane %v5850_v7, %v5884_v20 }
  0xa8   : > { %5017 = vmatpush3.bf16.msra.mxu1 %v5014_v2 }
  0xa9   : > { %v5982_v16 = vpack.c.bf16 %v2028_v8, %v2027_v9  ;;  %2678 = vbcast.lane.b32.xlu1 %v5948_v52, 296  ;;  %2674 = vbcast.lane.b32.xlu0 %v5948_v52, 288 }
  0xaa   : > { %v503_v18 = vpop.permute.xlu1 %502  ;;  %v499_v21 = vpop.permute.xlu0 %498 }
  0xab   : > { %7279 = vst [vmem:[#allocation9_spill] sm:$0xff] %v5982_v16  ;;  %v543_v23 = vmul.f32 %v503_v18, %v5977_v10  ;;  %v542_v25 = vmul.f32 %v499_v21, %v5980_v13  ;;  %5143 = vmatprep.subr.bf16.mxu0 %v5982_v16  ;;  %v6053_v21 = vmul.f32 %v5898_v24, %v298_v0  ;;  %v6100_v0 = vld [vmem:[%s5860_s24 + $0x38] sm:$0xff] }
  0xac   : > { %5145 = vmatpush3.bf16.msra.mxu0 %v5982_v16  ;;  %7285 = vst [vmem:[#allocation15_spill] sm:$0xff] %v6100_v0  ;;  %v6251_v16 = vld [vmem:[%s5860_s24 + $0xc0] sm:$0xff] }
  0xad   : > { %v5018_v28 = vpack.c.bf16 %v543_v23, %v542_v25  ;;  %2686 = vbcast.lane.b32.xlu1 %v5948_v52, 312  ;;  %2682 = vbcast.lane.b32.xlu0 %v5948_v52, 304  ;;  %v6056_v23 = vmul.f32 %v5898_v24, %v297_v1 }
  0xae   : > { %v1990_v31 = vpop.permute.xlu1 %1989  ;;  %v1986_v32 = vpop.permute.xlu0 %1985 }
  0xaf   : > { %v2030_v33 = vmul.f32 %v1990_v31, %v5977_v10  ;;  %v2029_v34 = vmul.f32 %v1986_v32, %v5980_v13  ;;  %5019 = vmatprep.subr.bf16.mxu1 %v5018_v28  ;;  %v299_v31 = vld [vmem:[%s7148_s4 + $0x70] sm:$0xff] }
  0xb0   : > { %5021 = vmatpush3.bf16.msra.mxu1 %v5018_v28  ;;  %v300_v28 = vld [vmem:[%s7148_s4 + $0x78] sm:$0xff] }
  0xb1   : > { %v6006_v39 = vpack.c.bf16 %v2030_v33, %v2029_v34  ;;  %2694 = vbcast.lane.b32.xlu1 %v5948_v52, 328  ;;  %2690 = vbcast.lane.b32.xlu0 %v5948_v52, 320 }
  0xb2   : > { %v511_v40 = vpop.permute.xlu1 %510  ;;  %v507_v41 = vpop.permute.xlu0 %506 }
  0xb3   : > { %7280 = vst [vmem:[#allocation10_spill] sm:$0xff] %v6006_v39  ;;  %v545_v43 = vmul.f32 %v511_v40, %v6001_v37  ;;  %v544_v45 = vmul.f32 %v507_v41, %v6004_v38  ;;  %5147 = vmatprep.subr.bf16.mxu0 %v6006_v39 }
  0xb4   : > { %5149 = vmatpush3.bf16.msra.mxu0 %v6006_v39 }
  0xb5   : > { %v5022_v48 = vpack.c.bf16 %v545_v43, %v544_v45  ;;  %2702 = vbcast.lane.b32.xlu1 %v5948_v52, 344  ;;  %2698 = vbcast.lane.b32.xlu0 %v5948_v52, 336  ;;  %v6077_v43 = vmul.f32 %v5898_v24, %v300_v28  ;;  %v6080_v45 = vmul.f32 %v5898_v24, %v299_v31  ;;  %v604_v24 = vrot.slane %v334_v47, 1 }
  0xb6   : > { %v1998_v49 = vpop.permute.xlu1 %1997  ;;  %v1994_v50 = vpop.permute.xlu0 %1993 }
  0xb7   : > { %v2032_v51 = vmul.f32 %v1998_v49, %v6001_v37  ;;  %v2031_v53 = vmul.f32 %v1994_v50, %v6004_v38  ;;  %5023 = vmatprep.subr.bf16.mxu1 %v5022_v48 }
  0xb8   : > { %5025 = vmatpush3.bf16.msra.mxu1 %v5022_v48 }
  0xb9   : > { %v6030_v56 = vpack.c.bf16 %v2032_v51, %v2031_v53  ;;  %2710 = vbcast.lane.b32.xlu1 %v5948_v52, 360  ;;  %2706 = vbcast.lane.b32.xlu0 %v5948_v52, 352 }
  0xba   : > { %v519_v60 = vpop.permute.xlu1 %518  ;;  %v515_v61 = vpop.permute.xlu0 %514 }
  0xbb   : > { %7281 = vst [vmem:[#allocation11_spill] sm:$0xff] %v6030_v56  ;;  %v547_v62 = vmul.f32 %v519_v60, %v6025_v54  ;;  %v546_v63 = vmul.f32 %v515_v61, %v6028_v55  ;;  %5151 = vmatprep.subr.bf16.mxu0 %v6030_v56  ;;  %v6094_v60 = vld [vmem:[%s5860_s24 + $0x28] sm:$0x3] }
  0xbc   : > { %5153 = vmatpush3.bf16.msra.mxu0 %v6030_v56  ;;  %v6233_v56 = vld [vmem:[%s5860_s24 + $0xb0] sm:$0xff] }
  0xbd   : > { %v5026_v2 = vpack.c.bf16 %v547_v62, %v546_v63  ;;  %2718 = vbcast.lane.b32.xlu1 %v5948_v52, 376  ;;  %2714 = vbcast.lane.b32.xlu0 %v5948_v52, 368  ;;  %v6097_v63 = vld [vmem:[%s5860_s24 + $0x30] sm:$0xff]  ;;  %7303 = vst [vmem:[#allocation33_spill] sm:$0xff] %v6233_v56  ;;  %v637_v39 = vrot.slane %v6233_v56, 1 }
  0xbe   : > { %v2006_v5 = vpop.permute.xlu1 %2005  ;;  %v2002_v8 = vpop.permute.xlu0 %2001  ;;  %7284 = vst [vmem:[#allocation14_spill] sm:$0xff] %v6097_v63 }
  0xbf   : > { %v2034_v9 = vmul.f32 %v2006_v5, %v6025_v54  ;;  %v2033_v18 = vmul.f32 %v2002_v8, %v6028_v55  ;;  %5027 = vmatprep.subr.bf16.mxu1 %v5026_v2  ;;  %v605_v5 = vsel %vm600_vm0, %v602_v14, %v604_v24  ;;  %v609_v8 = vrot.slane %v6094_v60, 1  ;;  %v6148_v24 = vld [vmem:[%s5860_s24 + $0x68] sm:$0xff] }
  0xc0   : > { %5029 = vmatpush3.bf16.msra.mxu1 %v5026_v2  ;;  %7290 = vst [vmem:[#allocation20_spill] sm:$0xff] %v6148_v24 }
  0xc1   : > { %v6058_v25 = vpack.c.bf16 %v2034_v9, %v2033_v18  ;;  %1172 = vbcast.lane.b32.xlu1 %v6048_v3, 264  ;;  %1168 = vbcast.lane.b32.xlu0 %v6048_v3, 256  ;;  %v611_v18 = vrot.slane %v6097_v63, 1  ;;  %v610_v28 = vsel %vm600_vm0, %v607_v17, %v609_v8 }
  0xc2   : > { %v527_v7 = vpop.permute.xlu1 %526  ;;  %v523_v52 = vpop.permute.xlu0 %522 }
  0xc3   : > { %7282 = vst [vmem:[#allocation12_spill] sm:$0xff] %v6058_v25  ;;  %v549_v26 = vmul.f32 %v527_v7, %v6053_v21  ;;  %v548_v27 = vmul.f32 %v523_v52, %v6056_v23  ;;  %5155 = vmatprep.subr.bf16.mxu0 %v6058_v25  ;;  %v612_v7 = vrot.slane %v6100_v0, 1  ;;  %v6115_v52 = vld [vmem:[%s5860_s24 + $0x40] sm:$0x3] }
  0xc4   : > { %5157 = vmatpush3.bf16.msra.mxu0 %v6058_v25  ;;  %v614_v31 = vrot.slane %v6115_v52, 1  ;;  %v6230_v25 = vld [vmem:[%s5860_s24 + $0xa8] sm:$0xff] }
  0xc5   : > { %v5030_v32 = vpack.c.bf16 %v549_v26, %v548_v27  ;;  %1180 = vbcast.lane.b32.xlu1 %v6048_v3, 280  ;;  %1176 = vbcast.lane.b32.xlu0 %v6048_v3, 272  ;;  %7302 = vst [vmem:[#allocation32_spill] sm:$0xff] %v6230_v25 }
  0xc6   : > { %v2014_v33 = vpop.permute.xlu1 %2013  ;;  %v2010_v34 = vpop.permute.xlu0 %2009 }
  0xc7   : > { %v2036_v40 = vmul.f32 %v2014_v33, %v6053_v21  ;;  %v2035_v41 = vmul.f32 %v2010_v34, %v6056_v23  ;;  %5031 = vmatprep.subr.bf16.mxu1 %v5030_v32  ;;  %v6130_v33 = vld [vmem:[%s5860_s24 + $0x50] sm:$0xff] }
  0xc8   : > { %5033 = vmatpush3.bf16.msra.mxu1 %v5030_v32  ;;  %v6127_v32 = vld [vmem:[%s5860_s24 + $0x48] sm:$0xff]  ;;  %7288 = vst [vmem:[#allocation18_spill] sm:$0xff] %v6130_v33 }
  0xc9   : > { %v6082_v46 = vpack.c.bf16 %v2036_v40, %v2035_v41  ;;  %1188 = vbcast.lane.b32.xlu1 %v6048_v3, 296  ;;  %1184 = vbcast.lane.b32.xlu0 %v6048_v3, 288  ;;  %7287 = vst [vmem:[#allocation17_spill] sm:$0xff] %v6127_v32  ;;  %v6135_v40 = vsel %vm600_vm0, %v611_v18, %v612_v7  ;;  %v6138_v41 = vld [vmem:[%s5860_s24 + $0x58] sm:$0x3]  ;;  %v622_v18 = vrot.slane %v6148_v24, 1 }
  0xca   : > { %v535_v48 = vpop.permute.xlu1 %534  ;;  %v531_v49 = vpop.permute.xlu0 %530  ;;  %7289 = vst [vmem:[#allocation19_spill] sm:$0xff] %v6135_v40 }
  0xcb   : > { %7283 = vst [vmem:[#allocation13_spill] sm:$0xff] %v6082_v46  ;;  %v551_v50 = vmul.f32 %v535_v48, %v6077_v43  ;;  %v550_v51 = vmul.f32 %v531_v49, %v6080_v45  ;;  %5159 = vmatprep.subr.bf16.mxu0 %v6082_v46  ;;  %v616_v49 = vrot.slane %v6127_v32, 1 }
  0xcc   : > { %5161 = vmatpush3.bf16.msra.mxu0 %v6082_v46 }
  0xcd   : > { %v5034_v53 = vpack.c.bf16 %v551_v50, %v550_v51  ;;  %1196 = vbcast.lane.b32.xlu1 %v6048_v3, 312  ;;  %1192 = vbcast.lane.b32.xlu0 %v6048_v3, 304  ;;  %v617_v50 = vrot.slane %v6130_v33, 1  ;;  %v6145_v51 = vld [vmem:[%s5860_s24 + $0x60] sm:$0xff] }
  0xce   : > { %v2022_v61 = vpop.permute.xlu1 %2021  ;;  %v2018_v62 = vpop.permute.xlu0 %2017  ;;  %v621_v8 = vrot.slane %v6145_v51, 1 }
  0xcf   : > { %v2038_v1 = vmul.f32 %v2022_v61, %v6077_v43  ;;  %v2037_v2 = vmul.f32 %v2018_v62, %v6080_v45  ;;  %5035 = vmatprep.subr.bf16.mxu1 %v5034_v53  ;;  %v619_v61 = vrot.slane %v6138_v41, 1 }
  0xd0   : > { %5037 = vmatpush3.bf16.msra.mxu1 %v5034_v53  ;;  %v6152_v53 = vsel %vm600_vm0, %v612_v7, %v614_v31  ;;  %v6177_v31 = vld [vmem:[%s5860_s24 + $0x80] sm:$0xff] }
  0xd1   : > { %v6108_v9 = vpack.c.bf16 %v2038_v1, %v2037_v2  ;;  %1204 = vbcast.lane.b32.xlu1 %v6048_v3, 328  ;;  %1200 = vbcast.lane.b32.xlu0 %v6048_v3, 320  ;;  %7291 = vst [vmem:[#allocation21_spill] sm:$0xff] %v6152_v53  ;;  %v6158_v1 = vld [vmem:[%s5860_s24 + $0x70] sm:$0x3]  ;;  %7295 = vst [vmem:[#allocation25_spill] sm:$0xff] %v6177_v31 }
  0xd2   : > { %v2316_v26 = vpop.permute.xlu1 %2315  ;;  %v2312_v11 = vpop.permute.xlu0 %2311 }
  0xd3   : > { %7286 = vst [vmem:[#allocation16_spill] sm:$0xff] %v6108_v9  ;;  %v2374_v14 = vmul.f32 %v2316_v26, %v5910_v30  ;;  %v2373_v27 = vmul.f32 %v2312_v11, %v5907_v29  ;;  %5163 = vmatprep.subr.bf16.mxu0 %v6108_v9  ;;  %4319 = vmatmul.mubr.f32.vlgmr.msra.gmra.mrb[0].mxu1 %v605_v5 }
  0xd4   : > { %5165 = vmatpush3.bf16.msra.mxu0 %v6108_v9  ;;  %4321 = vmatprep.mubr.f32.mxu1 %v5881_v19  ;;  %v6166_v11 = vsel %vm600_vm0, %v616_v49, %v617_v50  ;;  %v6191_v49 = vsel %vm600_vm0, %v621_v8, %v622_v18 }
  0xd5   : > { %v5166_v34 = vpack.c.bf16 %v2374_v14, %v2373_v27  ;;  %1212 = vbcast.lane.b32.xlu1 %v6048_v3, 344  ;;  %1208 = vbcast.lane.b32.xlu0 %v6048_v3, 336  ;;  %7292 = vst [vmem:[#allocation22_spill] sm:$0xff] %v6166_v11  ;;  %v6170_v14 = vsel %vm600_vm0, %v617_v50, %v619_v61  ;;  %v624_v27 = vrot.slane %v6158_v1, 1  ;;  %7296 = vst [vmem:[#allocation26_spill] sm:$0xff] %v6191_v49 }
  0xd6   : > { %v2324_v17 = vpop.permute.xlu1 %2323  ;;  %v2320_v19 = vpop.permute.xlu0 %2319  ;;  %7293 = vst [vmem:[#allocation23_spill] sm:$0xff] %v6170_v14  ;;  %v627_v61 = vrot.slane %v6177_v31, 1 }
  0xd7   : > { %v2376_v47 = vmul.f32 %v2324_v17, %v5919_v35  ;;  %v2375_v48 = vmul.f32 %v2320_v19, %v5922_v36  ;;  %4639 = vmatmul.mubr.f32.vlgmr.msra.gmra.mrb[0].mxu0 %v610_v28  ;;  %5167 = vmatprep.subr.bf16.mxu0 %v5166_v34  ;;  %v6183_v17 = vrot.slane %v5934_v44, %v5842_v4  ;;  %v6186_v19 = vld [vmem:[%s5860_s24 + $0x88] sm:$0x3] }
  0xd8   : > { %5169 = vmatpush3.bf16.msra.mxu0 %v5166_v34  ;;  %4641 = vmatprep.mubr.f32.mxu0 %v6135_v40  ;;  %v629_v8 = vrot.slane %v6186_v19, 1 }
  0xd9   : > { %v5170_v62 = vpack.c.bf16 %v2376_v47, %v2375_v48  ;;  %1220 = vbcast.lane.b32.xlu1 %v6048_v3, 360  ;;  %1216 = vbcast.lane.b32.xlu0 %v6048_v3, 352 }
  0xda   : > { %v2332_v2 = vpop.permute.xlu1 %2331  ;;  %v2328_v5 = vpop.permute.xlu0 %2327  ;;  %4322 = vmatmul.mubr.f32.gmra.mrb[2].mxu1 %v610_v28  ;;  %v6174_v28 = vld [vmem:[%s5860_s24 + $0x78] sm:$0xff]  ;;  %v6226_v9 = vsel %vm600_vm0, %v627_v61, %v629_v8 }
  0xdb   : > { %v2378_v7 = vmul.f32 %v2332_v2, %v5953_v57  ;;  %v2377_v26 = vmul.f32 %v2328_v5, %v5956_v58  ;;  %4642 = vmatmul.mubr.f32.gmra.mrb[2].mxu0 %v6152_v53  ;;  %5171 = vmatprep.subr.bf16.mxu0 %v5170_v62  ;;  %7294 = vst [vmem:[#allocation24_spill] sm:$0xff] %v6174_v28  ;;  %v626_v4 = vrot.slane %v6174_v28, 1  ;;  %v6202_v2 = vld [vmem:[%s5860_s24 + $0x98] sm:$0xff]  ;;  %7301 = vst [vmem:[#allocation31_spill] sm:$0xff] %v6226_v9 }
  0xdc   : > { %5173 = vmatpush3.bf16.msra.mxu0 %v5170_v62  ;;  %4324 = vmatprep.mubr.f32.mxu1 %v6135_v40  ;;  %v6199_v62 = vld [vmem:[%s5860_s24 + $0x90] sm:$0xff]  ;;  %7298 = vst [vmem:[#allocation28_spill] sm:$0xff] %v6202_v2  ;;  %v6206_v5 = vsel %vm600_vm0, %v622_v18, %v624_v27  ;;  %v632_v27 = vrot.slane %v6202_v2, 1 }
  0xdd   : > { %v5174_v34 = vpack.c.bf16 %v2378_v7, %v2377_v26  ;;  %1228 = vbcast.lane.b32.xlu1 %v6048_v3, 376  ;;  %1224 = vbcast.lane.b32.xlu0 %v6048_v3, 368  ;;  %7297 = vst [vmem:[#allocation27_spill] sm:$0xff] %v6199_v62  ;;  %7299 = vst [vmem:[#allocation29_spill] sm:$0xff] %v6206_v5  ;;  %v6212_v26 = vld [vmem:[%s5860_s24 + $0xa0] sm:$0x3] }
  0xde   : > { %v2340_v47 = vpop.permute.xlu1 %2339  ;;  %v2336_v48 = vpop.permute.xlu0 %2335  ;;  %4644 = vmatprep.mubr.f32.mxu0 %v6166_v11  ;;  %4325 = vmatmul.mubr.f32.gmra.mrb[4].mxu1 %v6152_v53  ;;  %v631_v18 = vrot.slane %v6199_v62, 1  ;;  %v634_v46 = vrot.slane %v6212_v26, 1 }
  0xdf   : > { %v2380_v50 = vmul.f32 %v2340_v47, %v5977_v10  ;;  %v2379_v3 = vmul.f32 %v2336_v48, %v5980_v13  ;;  %4645 = vmatmul.mubr.f32.gmra.mrb[4].mxu0 %v6170_v14  ;;  %5175 = vmatprep.subr.bf16.mxu0 %v5174_v34 }
  0xe0   : > { %5177 = vmatpush3.bf16.msra.mxu0 %v5174_v34  ;;  %4327 = vmatprep.mubr.f32.mxu1 %v6166_v11 }
  0xe1   : > { %v5178_v7 = vpack.c.bf16 %v2380_v50, %v2379_v3  ;;  %3002 = vbcast.lane.b32.xlu1 %v6183_v17, 264  ;;  %2998 = vbcast.lane.b32.xlu0 %v6183_v17, 256  ;;  %v6222_v3 = vsel %vm600_vm0, %v626_v4, %v627_v61  ;;  %v6238_v4 = vld [vmem:[%s5860_s24 + $0xb8] sm:$0x3]  ;;  %v6243_v61 = vsel %vm600_vm0, %v631_v18, %v632_v27 }
  0xe2   : > { %v2348_v47 = vpop.permute.xlu1 %2347  ;;  %v2344_v48 = vpop.permute.xlu0 %2343  ;;  %4647 = vmatprep.mubr.f32.mxu0 %v6191_v49  ;;  %4328 = vmatmul.mubr.f32.gmra.mrb[6].mxu1 %v6170_v14  ;;  %7300 = vst [vmem:[#allocation30_spill] sm:$0xff] %v6222_v3  ;;  %7304 = vst [vmem:[#allocation34_spill] sm:$0xff] %v6243_v61  ;;  %v6258_v18 = vsel %vm600_vm0, %v632_v27, %v634_v46  ;;  %v642_v46 = vrot.slane %v6254_v59, 1 }
  0xe3   : > { %v2382_v34 = vmul.f32 %v2348_v47, %v6001_v37  ;;  %v2381_v50 = vmul.f32 %v2344_v48, %v6004_v38  ;;  %4648 = vmatmul.mubr.f32.gmra.mrb[6].mxu0 %v6206_v5  ;;  %5179 = vmatprep.subr.bf16.mxu0 %v5178_v7  ;;  %7305 = vst [vmem:[#allocation35_spill] sm:$0xff] %v6258_v18 }
  0xe4   : > { %5181 = vmatpush3.bf16.msra.mxu0 %v5178_v7  ;;  %4330 = vmatprep.mubr.f32.mxu1 %v6191_v49 }
  0xe5   : > { %v5182_v47 = vpack.c.bf16 %v2382_v34, %v2381_v50  ;;  %3010 = vbcast.lane.b32.xlu1 %v6183_v17, 280  ;;  %3006 = vbcast.lane.b32.xlu0 %v6183_v17, 272  ;;  %v636_v50 = vrot.slane %v6230_v25, 1 }
  0xe6   : > { %v2356_v7 = vpop.permute.xlu1 %2355  ;;  %v2352_v48 = vpop.permute.xlu0 %2351  ;;  %4650 = vmatprep.mubr.f32.mxu0 %v6222_v3  ;;  %4331 = vmatmul.mubr.f32.gmra.mrb[8].mxu1 %v6206_v5 }
  0xe7   : > { %v2384_v8 = vmul.f32 %v2356_v7, %v6025_v54  ;;  %v2383_v34 = vmul.f32 %v2352_v48, %v6028_v55  ;;  %4651 = vmatmul.mubr.f32.gmra.mrb[8].mxu0 %v6226_v9  ;;  %5183 = vmatprep.subr.bf16.mxu0 %v5182_v47  ;;  %v639_v7 = vrot.slane %v6238_v4, 1 }
  0xe8   : > { %5185 = vmatpush3.bf16.msra.mxu0 %v5182_v47  ;;  %4333 = vmatprep.mubr.f32.mxu1 %v6222_v3  ;;  %v641_v47 = vrot.slane %v6251_v16, 1  ;;  %v644_v3 = vrot.slane %v6264_v42, 1 }
  0xe9   : > { %v5186_v48 = vpack.c.bf16 %v2384_v8, %v2383_v34  ;;  %3018 = vbcast.lane.b32.xlu1 %v6183_v17, 296  ;;  %3014 = vbcast.lane.b32.xlu0 %v6183_v17, 288  ;;  %v6274_v34 = vsel %vm600_vm0, %v636_v50, %v637_v39 }
  0xea   : > { %v2364_v5 = vpop.permute.xlu1 %2363  ;;  %v2360_v49 = vpop.permute.xlu0 %2359  ;;  %4653 = vmatprep.mubr.f32.mxu0 %v6243_v61  ;;  %4334 = vmatmul.mubr.f32.gmra.mrb[10].mxu1 %v6226_v9  ;;  %7306 = vst [vmem:[#allocation36_spill] sm:$0xff] %v6274_v34  ;;  %v6278_v9 = vsel %vm600_vm0, %v637_v39, %v639_v7  ;;  %v6286_v50 = vsel %vm600_vm0, %v641_v47, %v642_v46  ;;  %v6292_v39 = vld [vmem:[%s5860_s24 + $0xe0] sm:$0xff] }
  0xeb   : > { %v2386_v27 = vmul.f32 %v2364_v5, %v6053_v21  ;;  %v2385_v8 = vmul.f32 %v2360_v49, %v6056_v23  ;;  %4654 = vmatmul.mubr.f32.gmra.mrb[10].mxu0 %v6258_v18  ;;  %5187 = vmatprep.subr.bf16.mxu0 %v5186_v48  ;;  %7307 = vst [vmem:[#allocation37_spill] sm:$0xff] %v6278_v9  ;;  %7308 = vst [vmem:[#allocation38_spill] sm:$0xff] %v6286_v50 }
  0xec   : > { %5189 = vmatpush3.bf16.msra.mxu0 %v5186_v48  ;;  %4336 = vmatprep.mubr.f32.mxu1 %v6243_v61  ;;  %v6289_v48 = vld [vmem:[%s5860_s24 + $0xd8] sm:$0xff]  ;;  %v1253_v61 = vrot.slane %v5871_v15, 2  ;;  %v6302_v47 = vsel %vm600_vm0, %v642_v46, %v644_v3  ;;  %v647_v15 = vrot.slane %v6292_v39, 1  ;;  %v1257_v3 = vrot.slane %v6097_v63, 2  ;;  %v6354_v63 = vld [vmem:[%s5860_s24 + $0x110] sm:$0xff] }
  0xed   : > { %v5190_v14 = vpack.c.bf16 %v2386_v27, %v2385_v8  ;;  %3026 = vbcast.lane.b32.xlu1 %v6183_v17, 312  ;;  %3022 = vbcast.lane.b32.xlu0 %v6183_v17, 304  ;;  %v1252_v8 = vrot.slane %v5867_v12, 2  ;;  %7309 = vst [vmem:[#allocation39_spill] sm:$0xff] %v6302_v47  ;;  %v646_v12 = vrot.slane %v6289_v48, 1  ;;  %v1258_v46 = vrot.slane %v6100_v0, 2 }
  0xee   : > { %v2372_v49 = vpop.permute.xlu1 %2371  ;;  %v2368_v5 = vpop.permute.xlu0 %2367  ;;  %4656 = vmatprep.mubr.f32.mxu0 %v6274_v34  ;;  %4337 = vmatmul.mubr.f32.gmra.mrb[12].mxu1 %v6258_v18  ;;  %v1255_v18 = vrot.slane %v6094_v60, 2  ;;  %v1260_v0 = vrot.slane %v6115_v52, 2 }
  0xef   : > { %v2388_v7 = vmul.f32 %v2372_v49, %v6077_v43  ;;  %v2387_v27 = vmul.f32 %v2368_v5, %v6080_v45  ;;  %4657 = vmatmul.mubr.f32.gmra.mrb[12].mxu0 %v6278_v9  ;;  %5191 = vmatprep.subr.bf16.mxu0 %v5190_v14  ;;  %v6305_v49 = vld [vmem:[%s5860_s24 + $0xe8] sm:$0x3]  ;;  %v6325_v53 = vsel %vm1246_vm1, %v1252_v8, %v1253_v61 }
  0xf0   : > { %5193 = vmatpush3.bf16.msra.mxu0 %v5190_v14  ;;  %4339 = vmatprep.mubr.f32.mxu1 %v6274_v34  ;;  %7310 = vst [vmem:[#allocation40_spill] sm:$0xff] %v6325_v53  ;;  %v6330_v40 = vsel %vm1246_vm1, %v1253_v61, %v1255_v18  ;;  %v6339_v8 = vsel %vm600_vm0, %v646_v12, %v647_v15  ;;  %v6351_v12 = vld [vmem:[%s5860_s24 + $0x108] sm:$0xff] }
  0xf1   : > { %v5194_v5 = vpack.c.bf16 %v2388_v7, %v2387_v27  ;;  %3034 = vbcast.lane.b32.xlu1 %v6183_v17, 328  ;;  %3030 = vbcast.lane.b32.xlu0 %v6183_v17, 320  ;;  %v6316_v7 = vld [vmem:[%s5860_s24 + $0xf0] sm:$0xff]  ;;  %v6319_v27 = vld [vmem:[%s5860_s24 + $0xf8] sm:$0xff]  ;;  %7311 = vst [vmem:[#allocation41_spill] sm:$0xff] %v6330_v40  ;;  %7312 = vst [vmem:[#allocation42_spill] sm:$0xff] %v6339_v8  ;;  %v6346_v52 = vsel %vm1246_vm1, %v1257_v3, %v1258_v46 }
  0xf2   : > { %v396_v60 = vpop.permute.xlu1 %395  ;;  %v392_v14 = vpop.permute.xlu0 %391  ;;  %4659 = vmatprep.mubr.f32.mxu0 %v6286_v50  ;;  %4340 = vmatmul.mubr.f32.gmra.mrb[14].mxu1 %v6278_v9  ;;  %v649_v9 = vrot.slane %v6305_v49, 1  ;;  %7313 = vst [vmem:[#allocation43_spill] sm:$0xff] %v6346_v52 }
  0xf3   : > { %v454_v34 = vmul.f32 %v396_v60, %v5910_v30  ;;  %v453_v11 = vmul.f32 %v392_v14, %v5907_v29  ;;  %4660 = vmatmul.mubr.f32.gmra.mrb[14].mxu0 %v6302_v47  ;;  %5195 = vmatprep.subr.bf16.mxu0 %v5194_v5  ;;  %v6334_v60 = vld [vmem:[%s5860_s24 + $0x100] sm:$0x3] }
  0xf4   : > { %5197 = vmatpush3.bf16.msra.mxu0 %v5194_v5  ;;  %4342 = vmatprep.mubr.f32.mxu1 %v6286_v50  ;;  %v651_v5 = vrot.slane %v6316_v7, 1  ;;  %v652_v50 = vrot.slane %v6319_v27, 1  ;;  %v654_v3 = vrot.slane %v6334_v60, 1 }
  0xf5   : > { %v5038_v14 = vpack.c.bf16 %v454_v34, %v453_v11  ;;  %3042 = vbcast.lane.b32.xlu1 %v6183_v17, 344  ;;  %3038 = vbcast.lane.b32.xlu0 %v6183_v17, 336  ;;  %v1262_v11 = vrot.slane %v6127_v32, 2  ;;  %v1263_v34 = vrot.slane %v6130_v33, 2  ;;  %v1265_v33 = vrot.slane %v6138_v41, 2 }
  0xf6   : > { %v404_v61 = vpop.permute.xlu1 %403  ;;  %v400_v18 = vpop.permute.xlu0 %399  ;;  %4718 = vmatprep.mubr.f32.mxu0 %v6325_v53  ;;  %4343 = vmatmul.mubr.f32.gmra.mrb[16].mxu1 %v6302_v47  ;;  %v6360_v47 = vsel %vm600_vm0, %v647_v15, %v649_v9  ;;  %v6365_v53 = vsel %vm1246_vm1, %v1258_v46, %v1260_v0  ;;  %v6374_v9 = vsel %vm600_vm0, %v651_v5, %v652_v50  ;;  %v656_v15 = vrot.slane %v6351_v12, 1  ;;  %v6386_v5 = vld [vmem:[%s5860_s24 + $0x120] sm:$0xff] }
  0xf7   : > { %v456_v44 = vmul.f32 %v404_v61, %v5919_v35  ;;  %v455_v20 = vmul.f32 %v400_v18, %v5922_v36  ;;  %5039 = vmatprep.subr.bf16.mxu1 %v5038_v14  ;;  %4719 = vmatmul.mubr.f32.vlgmr.msra.gmra.mrb[0].mxu0 %v6330_v40  ;;  %7314 = vst [vmem:[#allocation44_spill] sm:$0xff] %v6360_v47  ;;  %7315 = vst [vmem:[#allocation45_spill] sm:$0xff] %v6365_v53  ;;  %v6369_v61 = vld [vmem:[%s5860_s24 + $0x118] sm:$0x3] }
  0xf8   : > { %5041 = vmatpush3.bf16.msra.mxu1 %v5038_v14  ;;  %4345 = vmatprep.mubr.f32.mxu1 %v6339_v8  ;;  %7316 = vst [vmem:[#allocation46_spill] sm:$0xff] %v6374_v9  ;;  %v657_v14 = vrot.slane %v6354_v63, 1  ;;  %v6381_v41 = vsel %vm1246_vm1, %v1262_v11, %v1263_v34  ;;  %v6389_v8 = vld [vmem:[%s5860_s24 + $0x128] sm:$0xff]  ;;  %v659_v11 = vrot.slane %v6369_v61, 1 }
  0xf9   : > { %v5042_v18 = vpack.c.bf16 %v456_v44, %v455_v20  ;;  %3050 = vbcast.lane.b32.xlu1 %v6183_v17, 360  ;;  %3046 = vbcast.lane.b32.xlu0 %v6183_v17, 352  ;;  %7317 = vst [vmem:[#allocation47_spill] sm:$0xff] %v6381_v41  ;;  %v1267_v20 = vrot.slane %v6145_v51, 2  ;;  %v1268_v44 = vrot.slane %v6148_v24, 2  ;;  %v6404_v24 = vrot.slane %v5847_v6, %v5890_v22 }
  0xfa   : > { %v412_v0 = vpop.permute.xlu1 %411  ;;  %v408_v46 = vpop.permute.xlu0 %407  ;;  %4721 = vmatprep.mubr.f32.mxu0 %v6346_v52  ;;  %4346 = vmatmul.mubr.f32.gmra.mrb[18].mxu1 %v6360_v47  ;;  %v6395_v47 = vsel %vm600_vm0, %v652_v50, %v654_v3  ;;  %v6400_v52 = vsel %vm1246_vm1, %v1263_v34, %v1265_v33  ;;  %v6413_v3 = vsel %vm600_vm0, %v656_v15, %v657_v14  ;;  %v661_v33 = vrot.slane %v6386_v5, 1 }
  0xfb   : > { %v458_v40 = vmul.f32 %v412_v0, %v5953_v57  ;;  %v457_v32 = vmul.f32 %v408_v46, %v5956_v58  ;;  %5043 = vmatprep.subr.bf16.mxu1 %v5042_v18  ;;  %4722 = vmatmul.mubr.f32.gmra.mrb[2].mxu0 %v6365_v53  ;;  %7318 = vst [vmem:[#allocation48_spill] sm:$0xff] %v6395_v47  ;;  %7319 = vst [vmem:[#allocation49_spill] sm:$0xff] %v6400_v52  ;;  %v1270_v0 = vrot.slane %v6158_v1, 2  ;;  %v6408_v46 = vld [vmem:[%s5860_s24 + $0x130] sm:$0x3] }
  0xfc   : > { %5045 = vmatpush3.bf16.msra.mxu1 %v5042_v18  ;;  %4348 = vmatprep.mubr.f32.mxu1 %v6374_v9  ;;  %7320 = vst [vmem:[#allocation50_spill] sm:$0xff] %v6413_v3  ;;  %v662_v34 = vrot.slane %v6389_v8, 1  ;;  %v1273_v1 = vrot.slane %v6177_v31, 2  ;;  %v6428_v18 = vld [vmem:[%s5860_s24 + $0x140] sm:$0xff]  ;;  %v1275_v53 = vrot.slane %v6186_v19, 2 }
  0xfd   : > { %v5046_v50 = vpack.c.bf16 %v458_v40, %v457_v32  ;;  %3058 = vbcast.lane.b32.xlu1 %v6183_v17, 376  ;;  %3054 = vbcast.lane.b32.xlu0 %v6183_v17, 368  ;;  %v6420_v32 = vsel %vm1246_vm1, %v1267_v20, %v1268_v44  ;;  %v1272_v40 = vrot.slane %v6174_v28, 2  ;;  %v6425_v17 = vld [vmem:[%s5860_s24 + $0x138] sm:$0xff]  ;;  %v664_v20 = vrot.slane %v6408_v46, 1 }
  0xfe   : > { %v420_v6 = vpop.permute.xlu1 %419  ;;  %v416_v22 = vpop.permute.xlu0 %415  ;;  %4724 = vmatprep.mubr.f32.mxu0 %v6381_v41  ;;  %4349 = vmatmul.mubr.f32.gmra.mrb[20].mxu1 %v6395_v47  ;;  %7321 = vst [vmem:[#allocation51_spill] sm:$0xff] %v6420_v32  ;;  %v6434_v47 = vsel %vm600_vm0, %v657_v14, %v659_v11  ;;  %v6439_v41 = vsel %vm1246_vm1, %v1268_v44, %v1270_v0  ;;  %v666_v11 = vrot.slane %v6425_v17, 1 }
  0xff   : > { %v460_v15 = vmul.f32 %v420_v6, %v5977_v10  ;;  %v459_v9 = vmul.f32 %v416_v22, %v5980_v13  ;;  %5047 = vmatprep.subr.bf16.mxu1 %v5046_v50  ;;  %4725 = vmatmul.mubr.f32.gmra.mrb[4].mxu0 %v6400_v52  ;;  %7322 = vst [vmem:[#allocation52_spill] sm:$0xff] %v6434_v47  ;;  %7323 = vst [vmem:[#allocation53_spill] sm:$0xff] %v6439_v41  ;;  %v6443_v6 = vld [vmem:[%s5860_s24 + $0x148] sm:$0x3] }
 0x100   : > { %5049 = vmatpush3.bf16.msra.mxu1 %v5046_v50  ;;  %4351 = vmatprep.mubr.f32.mxu1 %v6413_v3  ;;  %v6448_v14 = vsel %vm600_vm0, %v661_v33, %v662_v34  ;;  %v667_v50 = vrot.slane %v6428_v18, 1  ;;  %v6455_v19 = vsel %vm1246_vm1, %v1272_v40, %v1273_v1  ;;  %v6460_v33 = vld [vmem:[%s5860_s24 + $0x150] sm:$0xff]  ;;  %v6463_v3 = vld [vmem:[%s5860_s24 + $0x158] sm:$0xff]  ;;  %v669_v40 = vrot.slane %v6443_v6, 1 }
 0x101   : > { %v5050_v22 = vpack.c.bf16 %v460_v15, %v459_v9  ;;  %1625 = vbcast.lane.b32.xlu1 %v6404_v24, 264  ;;  %1621 = vbcast.lane.b32.xlu0 %v6404_v24, 256  ;;  %7324 = vst [vmem:[#allocation54_spill] sm:$0xff] %v6448_v14  ;;  %7325 = vst [vmem:[#allocation55_spill] sm:$0xff] %v6455_v19  ;;  %v1277_v9 = vrot.slane %v6199_v62, 2  ;;  %v1278_v15 = vrot.slane %v6202_v2, 2 }
 0x102   : > { %v428_v44 = vpop.permute.xlu1 %427  ;;  %v424_v0 = vpop.permute.xlu0 %423  ;;  %4727 = vmatprep.mubr.f32.mxu0 %v6420_v32  ;;  %4352 = vmatmul.mubr.f32.gmra.mrb[22].mxu1 %v6434_v47  ;;  %v6469_v47 = vsel %vm600_vm0, %v662_v34, %v664_v20  ;;  %v6473_v32 = vld [vmem:[%s5860_s24 + $0x160] sm:$0x3]  ;;  %v6477_v2 = vsel %vm1246_vm1, %v1273_v1, %v1275_v53  ;;  %v6483_v34 = vsel %vm600_vm0, %v666_v11, %v667_v50  ;;  %v671_v20 = vrot.slane %v6460_v33, 1  ;;  %v6496_v1 = vld [vmem:[%s5860_s24 + $0x168] sm:$0xff]  ;;  %v6499_v11 = vld [vmem:[%s5860_s24 + $0x170] sm:$0xff] }
 0x103   : > { %v462_v52 = vmul.f32 %v428_v44, %v6001_v37  ;;  %v461_v31 = vmul.f32 %v424_v0, %v6004_v38  ;;  %5051 = vmatprep.subr.bf16.mxu1 %v5050_v22  ;;  %4728 = vmatmul.mubr.f32.gmra.mrb[6].mxu0 %v6439_v41  ;;  %7326 = vst [vmem:[#allocation56_spill] sm:$0xff] %v6469_v47  ;;  %v1280_v44 = vrot.slane %v6212_v26, 2  ;;  %7327 = vst [vmem:[#allocation57_spill] sm:$0xff] %v6483_v34 }
 0x104   : > { %5053 = vmatpush3.bf16.msra.mxu1 %v5050_v22  ;;  %4354 = vmatprep.mubr.f32.mxu1 %v6448_v14  ;;  %v672_v22 = vrot.slane %v6463_v3, 1  ;;  %v6490_v53 = vsel %vm1246_vm1, %v1277_v9, %v1278_v15  ;;  %v1283_v26 = vrot.slane %v6233_v56, 2  ;;  %v6505_v9 = vsel %vm600_vm0, %v667_v50, %v669_v40 }
 0x105   : > { %v5054_v0 = vpack.c.bf16 %v462_v52, %v461_v31  ;;  %1633 = vbcast.lane.b32.xlu1 %v6404_v24, 280  ;;  %1629 = vbcast.lane.b32.xlu0 %v6404_v24, 272  ;;  %v1282_v31 = vrot.slane %v6230_v25, 2  ;;  %v674_v52 = vrot.slane %v6473_v32, 1  ;;  %7328 = vst [vmem:[#allocation58_spill] sm:$0xff] %v6505_v9  ;;  %v1285_v56 = vrot.slane %v6238_v4, 2 }
 0x106   : > { %v436_v14 = vpop.permute.xlu1 %435  ;;  %v432_v41 = vpop.permute.xlu0 %431  ;;  %4730 = vmatprep.mubr.f32.mxu0 %v6455_v19  ;;  %4355 = vmatmul.mubr.f32.gmra.mrb[24].mxu1 %v6469_v47  ;;  %v6509_v47 = vsel %vm1246_vm1, %v1278_v15, %v1280_v44  ;;  %v6513_v25 = vld [vmem:[%s5860_s24 + $0x178] sm:$0x3]  ;;  %v677_v50 = vrot.slane %v6499_v11, 1 }
 0x107   : > { %v464_v62 = vmul.f32 %v436_v14, %v6025_v54  ;;  %v463_v19 = vmul.f32 %v432_v41, %v6028_v55  ;;  %5055 = vmatprep.subr.bf16.mxu1 %v5054_v0  ;;  %4731 = vmatmul.mubr.f32.gmra.mrb[8].mxu0 %v6477_v2  ;;  %v6518_v41 = vsel %vm600_vm0, %v671_v20, %v672_v22  ;;  %v676_v14 = vrot.slane %v6496_v1, 1 }
 0x108   : > { %5057 = vmatpush3.bf16.msra.mxu1 %v5054_v0  ;;  %4357 = vmatprep.mubr.f32.mxu1 %v6483_v34  ;;  %7329 = vst [vmem:[#allocation59_spill] sm:$0xff] %v6518_v41  ;;  %v6525_v4 = vsel %vm1246_vm1, %v1282_v31, %v1283_v26  ;;  %v1288_v20 = vrot.slane %v6254_v59, 2  ;;  %v679_v34 = vrot.slane %v6513_v25, 1  ;;  %v6538_v31 = vsel %vm1246_vm1, %v1283_v26, %v1285_v56 }
 0x109   : > { %v5058_v28 = vpack.c.bf16 %v464_v62, %v463_v19  ;;  %1641 = vbcast.lane.b32.xlu1 %v6404_v24, 296  ;;  %1637 = vbcast.lane.b32.xlu0 %v6404_v24, 288  ;;  %v6528_v62 = vsel %vm600_vm0, %v672_v22, %v674_v52  ;;  %v1287_v19 = vrot.slane %v6251_v16, 2  ;;  %v1290_v22 = vrot.slane %v6264_v42, 2 }
 0x10a   : > { %v444_v40 = vpop.permute.xlu1 %443  ;;  %v440_v0 = vpop.permute.xlu0 %439  ;;  %4733 = vmatprep.mubr.f32.mxu0 %v6490_v53  ;;  %4358 = vmatmul.mubr.f32.gmra.mrb[26].mxu1 %v6505_v9  ;;  %7330 = vst [vmem:[#allocation60_spill] sm:$0xff] %v6528_v62  ;;  %v1293_v9 = vrot.slane %v6292_v39, 2  ;;  %v6555_v26 = vsel %vm600_vm0, %v677_v50, %v679_v34 }
 0x10b   : > { %v466_v15 = vmul.f32 %v444_v40, %v6053_v21  ;;  %v465_v44 = vmul.f32 %v440_v0, %v6056_v23  ;;  %5059 = vmatprep.subr.bf16.mxu1 %v5058_v28  ;;  %4734 = vmatmul.mubr.f32.gmra.mrb[10].mxu0 %v6509_v47  ;;  %v6544_v40 = vsel %vm600_vm0, %v676_v14, %v677_v50  ;;  %v1292_v0 = vrot.slane %v6289_v48, 2 }
 0x10c   : > { %5061 = vmatpush3.bf16.msra.mxu1 %v5058_v28  ;;  %4360 = vmatprep.mubr.f32.mxu1 %v6518_v41  ;;  %7331 = vst [vmem:[#allocation61_spill] sm:$0xff] %v6544_v40  ;;  %v6552_v42 = vsel %vm1246_vm1, %v1287_v19, %v1288_v20  ;;  %7332 = vst [vmem:[#allocation62_spill] sm:$0xff] %v6555_v26  ;;  %v1297_v50 = vrot.slane %v6316_v7, 2  ;;  %v1298_v19 = vrot.slane %v6319_v27, 2 }
 0x10d   : > { %v5062_v52 = vpack.c.bf16 %v466_v15, %v465_v44  ;;  %1649 = vbcast.lane.b32.xlu1 %v6404_v24, 312  ;;  %1645 = vbcast.lane.b32.xlu0 %v6404_v24, 304  ;;  %v6561_v44 = vsel %vm1246_vm1, %v1288_v20, %v1290_v22  ;;  %v6567_v34 = vsel %vm1246_vm1, %v1292_v0, %v1293_v9 }
 0x10e   : > { %4736 = vmatprep.mubr.f32.mxu0 %v6525_v4  ;;  %4361 = vmatmul.mubr.f32.gmra.mrb[28].mxu1 %v6528_v62  ;;  %v1295_v62 = vrot.slane %v6305_v49, 2  ;;  %7333 = vst [vmem:[#allocation63_spill] sm:$0xff] %v6567_v34  ;;  %v6575_v49 = vld [vmem:[%s5860_s24] sm:$0xff] }
 0x10f   : > { %v452_v56 = vpop.permute.xlu1 %451  ;;  %v448_v28 = vpop.permute.xlu0 %447  ;;  %5063 = vmatprep.subr.bf16.mxu1 %v5062_v52  ;;  %4737 = vmatmul.mubr.f32.gmra.mrb[12].mxu0 %v6538_v31 }
 0x110   : > { %v468_v14 = vmul.f32 %v452_v56, %v6077_v43  ;;  %v467_v15 = vmul.f32 %v448_v28, %v6080_v45  ;;  %5065 = vmatpush3.bf16.msra.mxu1 %v5062_v52  ;;  %4363 = vmatprep.mubr.f32.mxu1 %v6544_v40  ;;  %v6582_v28 = vsel %vm1246_vm1, %v1293_v9, %v1295_v62 }
 0x111   : > { %1657 = vbcast.lane.b32.xlu1 %v6404_v24, 328  ;;  %1653 = vbcast.lane.b32.xlu0 %v6404_v24, 320 }
 0x112   : > { %v5066_v56 = vpack.c.bf16 %v468_v14, %v467_v15  ;;  %4739 = vmatprep.mubr.f32.mxu0 %v6552_v42  ;;  %4364 = vmatmul.mubr.f32.gmra.mrb[30].mxu1 %v6555_v26  ;;  %v1300_v14 = vrot.slane %v6334_v60, 2  ;;  %v6588_v15 = vsel %vm1246_vm1, %v1297_v50, %v1298_v19  ;;  %v1305_v50 = vrot.slane %v6369_v61, 2 }
 0x113   : > { %v2663_v20 = vpop.permute.xlu1 %2662  ;;  %v2659_v22 = vpop.permute.xlu0 %2658  ;;  %4740 = vmatmul.mubr.f32.gmra.mrb[14].mxu0 %v6561_v44  ;;  %4398 = vmatprep.mubr.f32.mxu1 %v6575_v49  ;;  %7334 = vst [vmem:[#allocation64_spill] sm:$0xff] %v6588_v15 }
 0x114   : > { %v2721_v52 = vmul.f32 %v2663_v20, %v5910_v30  ;;  %v2720_v0 = vmul.f32 %v2659_v22, %v5907_v29  ;;  %5067 = vmatprep.subr.bf16.mxu1 %v5066_v56  ;;  %4742 = vmatprep.mubr.f32.mxu0 %v6567_v34  ;;  %v1302_v20 = vrot.slane %v6351_v12, 2  ;;  %v1303_v22 = vrot.slane %v6354_v63, 2  ;;  %v6601_v34 = vld [vmem:[%s5860_s24 + $0x8] sm:$0xff] }
 0x115   : > { %1665 = vbcast.lane.b32.xlu1 %v6404_v24, 344  ;;  %1661 = vbcast.lane.b32.xlu0 %v6404_v24, 336  ;;  %v6597_v62 = vsel %vm1246_vm1, %v1298_v19, %v1300_v14 }
 0x116   : > { %v5198_v26 = vpack.c.bf16 %v2721_v52, %v2720_v0  ;;  %5069 = vmatpush3.bf16.msra.mxu1 %v5066_v56  ;;  %7335 = vst [vmem:[#allocation65_spill] sm:$0xff] %v6597_v62  ;;  %v6606_v56 = vsel %vm1246_vm1, %v1302_v20, %v1303_v22  ;;  %v6612_v0 = vld [vmem:[%s5860_s24 + $0x18] sm:$0xff] }
 0x117   : > { %v2671_v40 = vpop.permute.xlu1 %2670  ;;  %v2667_v41 = vpop.permute.xlu0 %2666  ;;  %4743 = vmatmul.mubr.f32.gmra.mrb[16].mxu0 %v6582_v28  ;;  %7336 = vst [vmem:[#allocation66_spill] sm:$0xff] %v6606_v56  ;;  %7337 = vst [vmem:[#allocation67_spill] sm:$0xff] %v6612_v0 }
 0x118   : > { %v2723_v60 = vmul.f32 %v2671_v40, %v5919_v35  ;;  %v2722_v9 = vmul.f32 %v2667_v41, %v5922_v36  ;;  %5199 = vmatprep.subr.bf16.mxu0 %v5198_v26  ;;  %4745 = vmatprep.mubr.f32.mxu0 %v6588_v15  ;;  %v1307_v41 = vrot.slane %v6386_v5, 2  ;;  %v1308_v40 = vrot.slane %v6389_v8, 2 }
 0x119   : > { %4399 = vmatmul.mubr.f32.vlgmr.msra.gmra.mrb[0].mxu1 %v6601_v34  ;;  %1673 = vbcast.lane.b32.xlu1 %v6404_v24, 360 }
 0x11a   : > { %v5202_v52 = vpack.c.bf16 %v2723_v60, %v2722_v9  ;;  %1669 = vbcast.lane.b32.xlu0 %v6404_v24, 352  ;;  %5201 = vmatpush3.bf16.msra.mxu0 %v5198_v26  ;;  %v6620_v60 = vsel %vm1246_vm1, %v1303_v22, %v1305_v50  ;;  %v1310_v26 = vrot.slane %v6408_v46, 2  ;;  %v6624_v9 = vld [vmem:[%s5860_s24 + $0x20] sm:$0xff]  ;;  %v1313_v22 = vrot.slane %v6428_v18, 2 }
 0x11b   : > { %v2679_v19 = vpop.permute.xlu1 %2678  ;;  %v2675_v61 = vpop.permute.xlu0 %2674  ;;  %4401 = vmatprep.mubr.f32.mxu1 %v6612_v0  ;;  %4746 = vmatmul.mubr.f32.gmra.mrb[18].mxu0 %v6597_v62  ;;  %7338 = vst [vmem:[#allocation68_spill] sm:$0xff] %v6624_v9  ;;  %v7339_v0 = vld [vmem:[#allocation5_spill] sm:$0xff]  ;;  %v7340_v62 = vld [vmem:[#allocation7_spill] sm:$0xff] }
 0x11c   : > { %v2725_v14 = vmul.f32 %v2679_v19, %v5953_v57  ;;  %v2724_v20 = vmul.f32 %v2675_v61, %v5956_v58  ;;  %5203 = vmatprep.subr.bf16.mxu0 %v5202_v52  ;;  %4748 = vmatprep.mubr.f32.mxu0 %v6606_v56  ;;  %v6630_v15 = vrot.slane %v7340_v62, %v7339_v0  ;;  %v1312_v61 = vrot.slane %v6425_v17, 2 }
 0x11d   : > { %4402 = vmatmul.mubr.f32.gmra.mrb[2].mxu1 %v6624_v9  ;;  %1681 = vbcast.lane.b32.xlu1 %v6404_v24, 376  ;;  %v6633_v19 = vsel %vm1246_vm1, %v1307_v41, %v1308_v40  ;;  %v7342_v9 = vld [vmem:[#allocation14_spill] sm:$0xff]  ;;  %v6644_v41 = vsel %vm1246_vm1, %v1308_v40, %v1310_v26  ;;  %v7346_v26 = vld [vmem:[#allocation17_spill] sm:$0xff] }
 0x11e   : > { %7341 = vst [vmem:[#allocation5_spill] sm:$0xff] %v6633_v19  ;;  %v5206_v50 = vpack.c.bf16 %v2725_v14, %v2724_v20  ;;  %1677 = vbcast.lane.b32.xlu0 %v6404_v24, 368  ;;  %5205 = vmatpush3.bf16.msra.mxu0 %v5202_v52  ;;  %7343 = vst [vmem:[#allocation7_spill] sm:$0xff] %v6644_v41  ;;  %v1315_v14 = vrot.slane %v6443_v6, 2  ;;  %v7344_v24 = vld [vmem:[#allocation15_spill] sm:$0xff]  ;;  %v6650_v52 = vsel %vm1246_vm1, %v1312_v61, %v1313_v22 }
 0x11f   : > { %v2687_v46 = vpop.permute.xlu1 %2686  ;;  %v2683_v56 = vpop.permute.xlu0 %2682  ;;  %4404 = vmatprep.mubr.f32.mxu1 %v7342_v9  ;;  %4749 = vmatmul.mubr.f32.gmra.mrb[20].mxu0 %v6620_v60  ;;  %7345 = vst [vmem:[#allocation14_spill] sm:$0xff] %v6650_v52  ;;  %v1317_v20 = vrot.slane %v6460_v33, 2  ;;  %v1318_v9 = vrot.slane %v6463_v3, 2 }
 0x120   : > { %v2727_v62 = vmul.f32 %v2687_v46, %v5977_v10  ;;  %v2726_v0 = vmul.f32 %v2683_v56, %v5980_v13  ;;  %5207 = vmatprep.subr.bf16.mxu0 %v5206_v50  ;;  %4751 = vmatprep.mubr.f32.mxu0 %v6633_v19  ;;  %v7357_v19 = vld [vmem:[#allocation27_spill] sm:$0xff] }
 0x121   : > { %4405 = vmatmul.mubr.f32.gmra.mrb[4].mxu1 %v7344_v24  ;;  %3352 = vbcast.lane.b32.xlu1 %v6630_v15, 264  ;;  %v6667_v24 = vsel %vm1246_vm1, %v1317_v20, %v1318_v9 }
 0x122   : > { %v5210_v56 = vpack.c.bf16 %v2727_v62, %v2726_v0  ;;  %3348 = vbcast.lane.b32.xlu0 %v6630_v15, 256  ;;  %5209 = vmatpush3.bf16.msra.mxu0 %v5206_v50  ;;  %v6661_v62 = vsel %vm1246_vm1, %v1313_v22, %v1315_v14  ;;  %v1320_v50 = vrot.slane %v6473_v32, 2  ;;  %v7348_v0 = vld [vmem:[#allocation18_spill] sm:$0xff]  ;;  %7349 = vst [vmem:[#allocation17_spill] sm:$0xff] %v6667_v24 }
 0x123   : > { %v2695_v46 = vpop.permute.xlu1 %2694  ;;  %v2691_v40 = vpop.permute.xlu0 %2690  ;;  %4407 = vmatprep.mubr.f32.mxu1 %v7346_v26  ;;  %4752 = vmatmul.mubr.f32.gmra.mrb[22].mxu0 %v6644_v41  ;;  %7347 = vst [vmem:[#allocation15_spill] sm:$0xff] %v6661_v62  ;;  %v1322_v26 = vrot.slane %v6496_v1, 2  ;;  %v6676_v22 = vld [vmem:[%s5860_s24 + $0x188] sm:$0xff] }
 0x124   : > { %v2729_v6 = vmul.f32 %v2695_v46, %v6001_v37  ;;  %v2728_v61 = vmul.f32 %v2691_v40, %v6004_v38  ;;  %5211 = vmatprep.subr.bf16.mxu0 %v5210_v56  ;;  %4754 = vmatprep.mubr.f32.mxu0 %v6650_v52  ;;  %v1323_v46 = vrot.slane %v6499_v11, 2  ;;  %v6673_v52 = vld [vmem:[%s5860_s24 + $0x180] sm:$0xff] }
 0x125   : > { %4408 = vmatmul.mubr.f32.gmra.mrb[6].mxu1 %v7348_v0  ;;  %3360 = vbcast.lane.b32.xlu1 %v6630_v15, 280 }
 0x126   : > { %v5214_v40 = vpack.c.bf16 %v2729_v6, %v2728_v61  ;;  %3356 = vbcast.lane.b32.xlu0 %v6630_v15, 272  ;;  %5213 = vmatpush3.bf16.msra.mxu0 %v5210_v56  ;;  %v6684_v56 = vsel %vm1246_vm1, %v1318_v9, %v1320_v50  ;;  %v1325_v6 = vrot.slane %v6513_v25, 2  ;;  %v7351_v61 = vld [vmem:[#allocation20_spill] sm:$0xff] }
 0x127   : > { %v2703_v32 = vpop.permute.xlu1 %2702  ;;  %v2699_v14 = vpop.permute.xlu0 %2698  ;;  %4410 = vmatprep.mubr.f32.mxu1 %v6145_v51  ;;  %4755 = vmatmul.mubr.f32.gmra.mrb[24].mxu0 %v6661_v62  ;;  %7350 = vst [vmem:[#allocation18_spill] sm:$0xff] %v6684_v56  ;;  %v6690_v51 = vsel %vm1246_vm1, %v1322_v26, %v1323_v46  ;;  %v2389_v62 = vrot.slane %v6673_v52, 2  ;;  %v7353_v25 = vld [vmem:[#allocation24_spill] sm:$0xff] }
 0x128   : > { %v2731_v20 = vmul.f32 %v2703_v32, %v6025_v54  ;;  %v2730_v0 = vmul.f32 %v2699_v14, %v6028_v55  ;;  %5215 = vmatprep.subr.bf16.mxu0 %v5214_v40  ;;  %4757 = vmatprep.mubr.f32.mxu0 %v6667_v24  ;;  %v2390_v32 = vrot.slane %v6676_v22, 2  ;;  %v6695_v14 = vld [vmem:[%s5860_s24 + $0x190] sm:$0x3]  ;;  %v6704_v24 = vsel %vm1246_vm1, %v1323_v46, %v1325_v6 }
 0x129   : > { %4411 = vmatmul.mubr.f32.gmra.mrb[8].mxu1 %v7351_v61  ;;  %3368 = vbcast.lane.b32.xlu1 %v6630_v15, 296  ;;  %7352 = vst [vmem:[#allocation20_spill] sm:$0xff] %v6695_v14  ;;  %7354 = vst [vmem:[#allocation24_spill] sm:$0xff] %v6704_v24 }
 0x12a   : > { %v5218_v41 = vpack.c.bf16 %v2731_v20, %v2730_v0  ;;  %3364 = vbcast.lane.b32.xlu0 %v6630_v15, 288  ;;  %5217 = vmatpush3.bf16.msra.mxu0 %v5214_v40  ;;  %v2392_v20 = vrot.slane %v6695_v14, 2  ;;  %v7355_v0 = vld [vmem:[#allocation25_spill] sm:$0xff]  ;;  %v6710_v40 = vsel %vm1246_vm1, %v2389_v62, %v2390_v32 }
 0x12b   : > { %v2711_v9 = vpop.permute.xlu1 %2710  ;;  %v2707_v50 = vpop.permute.xlu0 %2706  ;;  %4413 = vmatprep.mubr.f32.mxu1 %v7353_v25  ;;  %4758 = vmatmul.mubr.f32.gmra.mrb[26].mxu0 %v6684_v56  ;;  %7356 = vst [vmem:[#allocation25_spill] sm:$0xff] %v6710_v40 }
 0x12c   : > { %v2733_v61 = vmul.f32 %v2711_v9, %v6053_v21  ;;  %v2732_v26 = vmul.f32 %v2707_v50, %v6056_v23  ;;  %5219 = vmatprep.subr.bf16.mxu0 %v5218_v41  ;;  %4760 = vmatprep.mubr.f32.mxu0 %v6690_v51  ;;  %v6719_v62 = vsel %vm1246_vm1, %v2390_v32, %v2392_v20  ;;  %v6729_v32 = vld [vmem:[%s5860_s24 + $0x30] sm:$0xff]  ;;  %v7362_v20 = vld [vmem:[#allocation33_spill] sm:$0xff] }
 0x12d   : > { %4414 = vmatmul.mubr.f32.gmra.mrb[10].mxu1 %v7355_v0  ;;  %3376 = vbcast.lane.b32.xlu1 %v6630_v15, 312  ;;  %7358 = vst [vmem:[#allocation27_spill] sm:$0xff] %v6719_v62 }
 0x12e   : > { %v5222_v56 = vpack.c.bf16 %v2733_v61, %v2732_v26  ;;  %3372 = vbcast.lane.b32.xlu0 %v6630_v15, 304  ;;  %5221 = vmatpush3.bf16.msra.mxu0 %v5218_v41  ;;  %v7359_v61 = vld [vmem:[#allocation28_spill] sm:$0xff] }
 0x12f   : > { %v2719_v9 = vpop.permute.xlu1 %2718  ;;  %v2715_v50 = vpop.permute.xlu0 %2714  ;;  %4416 = vmatprep.mubr.f32.mxu1 %v7357_v19  ;;  %4761 = vmatmul.mubr.f32.gmra.mrb[28].mxu0 %v6704_v24  ;;  %7361 = vst [vmem:[#allocation28_spill] sm:$0xff] %v6729_v32 }
 0x130   : > { %v2735_v46 = vmul.f32 %v2719_v9, %v6077_v43  ;;  %v2734_v6 = vmul.f32 %v2715_v50, %v6080_v45  ;;  %5223 = vmatprep.subr.bf16.mxu0 %v5222_v56  ;;  %4763 = vmatprep.mubr.f32.mxu0 %v6710_v40  ;;  %v7360_v9 = vld [vmem:[#allocation32_spill] sm:$0xff] }
 0x131   : > { %4417 = vmatmul.mubr.f32.gmra.mrb[12].mxu1 %v7359_v61  ;;  %3384 = vbcast.lane.b32.xlu1 %v6630_v15, 328 }
 0x132   : > { %v5226_v41 = vpack.c.bf16 %v2735_v46, %v2734_v6  ;;  %3380 = vbcast.lane.b32.xlu0 %v6630_v15, 320  ;;  %5225 = vmatpush3.bf16.msra.mxu0 %v5222_v56 }
 0x133   : > { %v1173_v26 = vpop.permute.xlu1 %1172  ;;  %v1169_v14 = vpop.permute.xlu0 %1168  ;;  %4419 = vmatprep.mubr.f32.mxu1 %v7360_v9  ;;  %4764 = vmatmul.mubr.f32.gmra.mrb[30].mxu0 %v6719_v62  ;;  %v6740_v62 = vld [vmem:[%s5860_s24 + $0x38] sm:$0xff] }
 0x134   : > { %v1231_v50 = vmul.f32 %v1173_v26, %v5910_v30  ;;  %v1230_v40 = vmul.f32 %v1169_v14, %v5907_v29  ;;  %5227 = vmatprep.subr.bf16.mxu0 %v5226_v41  ;;  %4798 = vmatprep.mubr.f32.mxu0 %v6729_v32  ;;  %7363 = vst [vmem:[#allocation32_spill] sm:$0xff] %v6740_v62  ;;  %v6749_v32 = vld [vmem:[%s5860_s24 + $0x48] sm:$0xff] }
 0x135   : > { %4420 = vmatmul.mubr.f32.gmra.mrb[14].mxu1 %v7362_v20  ;;  %3392 = vbcast.lane.b32.xlu1 %v6630_v15, 344  ;;  %7364 = vst [vmem:[#allocation33_spill] sm:$0xff] %v6749_v32 }
 0x136   : > { %v5070_v56 = vpack.c.bf16 %v1231_v50, %v1230_v40  ;;  %3388 = vbcast.lane.b32.xlu0 %v6630_v15, 336  ;;  %5229 = vmatpush3.bf16.msra.mxu0 %v5226_v41 }
 0x137   : > { %v1181_v46 = vpop.permute.xlu1 %1180  ;;  %v1177_v6 = vpop.permute.xlu0 %1176  ;;  %4422 = vmatprep.mubr.f32.mxu1 %v6251_v16 }
 0x138   : > { %v1233_v14 = vmul.f32 %v1181_v46, %v5919_v35  ;;  %v1232_v26 = vmul.f32 %v1177_v6, %v5922_v36  ;;  %5071 = vmatprep.subr.bf16.mxu1 %v5070_v56 }
 0x139   : > { %4423 = vmatmul.mubr.f32.gmra.mrb[16].mxu1 %v6254_v59  ;;  %4799 = vmatmul.mubr.f32.vlgmr.msra.gmra.mrb[0].mxu0 %v6740_v62  ;;  %v6763_v62 = vld [vmem:[%s5860_s24 + $0x60] sm:$0xff] }
 0x13a   : > { %v5074_v40 = vpack.c.bf16 %v1233_v14, %v1232_v26  ;;  %3400 = vbcast.lane.b32.xlu1 %v6630_v15, 360  ;;  %3396 = vbcast.lane.b32.xlu0 %v6630_v15, 352  ;;  %v6754_v14 = vld [vmem:[%s5860_s24 + $0x50] sm:$0xff]  ;;  %7365 = vst [vmem:[#allocation69_spill] sm:$0xff] %v6763_v62 }
 0x13b   : > { %5073 = vmatpush3.bf16.msra.mxu1 %v5070_v56  ;;  %v1189_v41 = vpop.permute.xlu1 %1188  ;;  %v1185_v50 = vpop.permute.xlu0 %1184  ;;  %4425 = vmatprep.mubr.f32.mxu1 %v6289_v48 }
 0x13c   : > { %v1235_v46 = vmul.f32 %v1189_v41, %v5953_v57  ;;  %v1234_v6 = vmul.f32 %v1185_v50, %v5956_v58  ;;  %4801 = vmatprep.mubr.f32.mxu0 %v6749_v32  ;;  %5075 = vmatprep.subr.bf16.mxu1 %v5074_v40 }
 0x13d   : > { %4426 = vmatmul.mubr.f32.gmra.mrb[18].mxu1 %v6292_v39  ;;  %4802 = vmatmul.mubr.f32.gmra.mrb[2].mxu0 %v6754_v14 }
 0x13e   : > { %v5078_v56 = vpack.c.bf16 %v1235_v46, %v1234_v6  ;;  %3408 = vbcast.lane.b32.xlu1 %v6630_v15, 376  ;;  %3404 = vbcast.lane.b32.xlu0 %v6630_v15, 368  ;;  %v6768_v46 = vld [vmem:[%s5860_s24 + $0x68] sm:$0xff] }
 0x13f   : > { %5077 = vmatpush3.bf16.msra.mxu1 %v5074_v40  ;;  %v1197_v26 = vpop.permute.xlu1 %1196  ;;  %v1193_v41 = vpop.permute.xlu0 %1192  ;;  %4428 = vmatprep.mubr.f32.mxu1 %v6316_v7 }
 0x140   : > { %v1237_v50 = vmul.f32 %v1197_v26, %v5977_v10  ;;  %v1236_v32 = vmul.f32 %v1193_v41, %v5980_v13  ;;  %4804 = vmatprep.mubr.f32.mxu0 %v6763_v62  ;;  %5079 = vmatprep.subr.bf16.mxu1 %v5078_v56 }
 0x141   : > { %4429 = vmatmul.mubr.f32.gmra.mrb[20].mxu1 %v6319_v27  ;;  %4805 = vmatmul.mubr.f32.gmra.mrb[4].mxu0 %v6768_v46 }
 0x142   : > { %v5082_v15 = vpack.c.bf16 %v1237_v50, %v1236_v32  ;;  %4431 = vmatprep.mubr.f32.mxu1 %v6351_v12  ;;  %4807 = vmatprep.mubr.f32.mxu0 %v7353_v25 }
 0x143   : > { %5081 = vmatpush3.bf16.msra.mxu1 %v5078_v56  ;;  %v1205_v40 = vpop.permute.xlu1 %1204  ;;  %v1201_v6 = vpop.permute.xlu0 %1200 }
 0x144   : > { %v1239_v26 = vmul.f32 %v1205_v40, %v6001_v37  ;;  %v1238_v41 = vmul.f32 %v1201_v6, %v6004_v38  ;;  %5083 = vmatprep.subr.bf16.mxu1 %v5082_v15 }
 0x145   : > { %4432 = vmatmul.mubr.f32.gmra.mrb[22].mxu1 %v6354_v63  ;;  %4808 = vmatmul.mubr.f32.gmra.mrb[6].mxu0 %v7355_v0 }
 0x146   : > { %v5086_v62 = vpack.c.bf16 %v1239_v26, %v1238_v41  ;;  %4434 = vmatprep.mubr.f32.mxu1 %v6386_v5  ;;  %4810 = vmatprep.mubr.f32.mxu0 %v7357_v19  ;;  %v1248_v41 = vrot.slane %v6601_v34, 2 }
 0x147   : > { %5085 = vmatpush3.bf16.msra.mxu1 %v5082_v15  ;;  %v1213_v32 = vpop.permute.xlu1 %1212  ;;  %v1209_v25 = vpop.permute.xlu0 %1208 }
 0x148   : > { %v1241_v56 = vmul.f32 %v1213_v32, %v6025_v54  ;;  %v1240_v50 = vmul.f32 %v1209_v25, %v6028_v55  ;;  %5087 = vmatprep.subr.bf16.mxu1 %v5086_v62 }
 0x149   : > { %4435 = vmatmul.mubr.f32.gmra.mrb[24].mxu1 %v6389_v8  ;;  %4811 = vmatmul.mubr.f32.gmra.mrb[8].mxu0 %v7359_v61 }
 0x14a   : > { %v5090_v40 = vpack.c.bf16 %v1241_v56, %v1240_v50  ;;  %4437 = vmatprep.mubr.f32.mxu1 %v6425_v17  ;;  %4813 = vmatprep.mubr.f32.mxu0 %v7360_v9  ;;  %v1247_v9 = vrot.slane %v6575_v49, 2 }
 0x14b   : > { %5089 = vmatpush3.bf16.msra.mxu1 %v5086_v62  ;;  %v1221_v0 = vpop.permute.xlu1 %1220  ;;  %v1217_v19 = vpop.permute.xlu0 %1216 }
 0x14c   : > { %v1243_v15 = vmul.f32 %v1221_v0, %v6053_v21  ;;  %v1242_v6 = vmul.f32 %v1217_v19, %v6056_v23  ;;  %5091 = vmatprep.subr.bf16.mxu1 %v5090_v40  ;;  %v1249_v34 = vsel %vm1246_vm1, %v1247_v9, %v1248_v41  ;;  %v7366_v9 = vld [vmem:[#allocation40_spill] sm:$0xff] }
 0x14d   : > { %4438 = vmatmul.mubr.f32.gmra.mrb[26].mxu1 %v6428_v18  ;;  %4814 = vmatmul.mubr.f32.gmra.mrb[10].mxu0 %v7362_v20 }
 0x14e   : > { %v5094_v26 = vpack.c.bf16 %v1243_v15, %v1242_v6  ;;  %4440 = vmatprep.mubr.f32.mxu1 %v6460_v33  ;;  %4816 = vmatprep.mubr.f32.mxu0 %v6251_v16  ;;  %v5634_v16 = vld [vmem:[%s5860_s24 + $0x10] sm:$0x3] }
 0x14f   : > { %5093 = vmatpush3.bf16.msra.mxu1 %v5090_v40  ;;  %v1229_v61 = vpop.permute.xlu1 %1228  ;;  %v1225_v62 = vpop.permute.xlu0 %1224  ;;  %v1250_v56 = vrot.slane %v5634_v16, 2  ;;  %v7368_v16 = vld [vmem:[#allocation43_spill] sm:$0xff] }
 0x150   : > { %v1245_v32 = vmul.f32 %v1229_v61, %v6077_v43  ;;  %v1244_v25 = vmul.f32 %v1225_v62, %v6080_v45  ;;  %5095 = vmatprep.subr.bf16.mxu1 %v5094_v26 }
 0x151   : > { %4441 = vmatmul.mubr.f32.gmra.mrb[28].mxu1 %v6463_v3  ;;  %4817 = vmatmul.mubr.f32.gmra.mrb[12].mxu0 %v6254_v59  ;;  %v1251_v15 = vsel %vm1246_vm1, %v1248_v41, %v1250_v56 }
 0x152   : > { %v5098_v20 = vpack.c.bf16 %v1245_v32, %v1244_v25  ;;  %4443 = vmatprep.mubr.f32.mxu1 %v6496_v1  ;;  %4819 = vmatprep.mubr.f32.mxu0 %v6289_v48  ;;  %v7367_v25 = vld [vmem:[#allocation41_spill] sm:$0xff] }
 0x153   : > { %5097 = vmatpush3.bf16.msra.mxu1 %v5094_v26  ;;  %v3003_v49 = vpop.permute.xlu1 %3002  ;;  %v2999_v50 = vpop.permute.xlu0 %2998 }
 0x154   : > { %v3061_v40 = vmul.f32 %v3003_v49, %v5910_v30  ;;  %v3060_v0 = vmul.f32 %v2999_v50, %v5907_v29  ;;  %5099 = vmatprep.subr.bf16.mxu1 %v5098_v20  ;;  %v7369_v50 = vld [vmem:[#allocation45_spill] sm:$0xff] }
 0x155   : > { %4444 = vmatmul.mubr.f32.gmra.mrb[30].mxu1 %v6499_v11  ;;  %4820 = vmatmul.mubr.f32.gmra.mrb[14].mxu0 %v6292_v39 }
 0x156   : > { %v5230_v59 = vpack.c.bf16 %v3061_v40, %v3060_v0  ;;  %4478 = vmatprep.mubr.f32.mxu1 %v1249_v34  ;;  %4822 = vmatprep.mubr.f32.mxu0 %v6316_v7  ;;  %v7370_v40 = vld [vmem:[#allocation47_spill] sm:$0xff] }
 0x157   : > { %5101 = vmatpush3.bf16.msra.mxu1 %v5098_v20  ;;  %v3011_v48 = vpop.permute.xlu1 %3010  ;;  %v3007_v19 = vpop.permute.xlu0 %3006 }
 0x158   : > { %v3063_v6 = vmul.f32 %v3011_v48, %v5919_v35  ;;  %v3062_v26 = vmul.f32 %v3007_v19, %v5922_v36  ;;  %5231 = vmatprep.subr.bf16.mxu0 %v5230_v59  ;;  %v7371_v48 = vld [vmem:[#allocation49_spill] sm:$0xff] }
 0x159   : > { %4823 = vmatmul.mubr.f32.gmra.mrb[16].mxu0 %v6319_v27 }
 0x15a   : > { %v5234_v61 = vpack.c.bf16 %v3063_v6, %v3062_v26  ;;  %4479 = vmatmul.mubr.f32.vlgmr.msra.gmra.mrb[0].mxu1 %v1251_v15  ;;  %5233 = vmatpush3.bf16.msra.mxu0 %v5230_v59  ;;  %v7372_v15 = vld [vmem:[#allocation51_spill] sm:$0xff] }
 0x15b   : > { %v3019_v39 = vpop.permute.xlu1 %3018  ;;  %v3015_v62 = vpop.permute.xlu0 %3014  ;;  %4481 = vmatprep.mubr.f32.mxu1 %v7366_v9  ;;  %4825 = vmatprep.mubr.f32.mxu0 %v6351_v12 }
 0x15c   : > { %v3065_v7 = vmul.f32 %v3019_v39, %v5953_v57  ;;  %v3064_v41 = vmul.f32 %v3015_v62, %v5956_v58  ;;  %5235 = vmatprep.subr.bf16.mxu0 %v5234_v61  ;;  %v7374_v62 = vld [vmem:[#allocation55_spill] sm:$0xff] }
 0x15d   : > { %4826 = vmatmul.mubr.f32.gmra.mrb[18].mxu0 %v6354_v63 }
 0x15e   : > { %v5238_v32 = vpack.c.bf16 %v3065_v7, %v3064_v41  ;;  %4482 = vmatmul.mubr.f32.gmra.mrb[2].mxu1 %v7367_v25  ;;  %5237 = vmatpush3.bf16.msra.mxu0 %v5234_v61  ;;  %v7373_v61 = vld [vmem:[#allocation53_spill] sm:$0xff]  ;;  %v6845_v25 = vld [vmem:[%s5860_s24 + $0x198] sm:$0xff] }
 0x15f   : > { %v3027_v27 = vpop.permute.xlu1 %3026  ;;  %v3023_v20 = vpop.permute.xlu0 %3022  ;;  %4484 = vmatprep.mubr.f32.mxu1 %v7368_v16  ;;  %4828 = vmatprep.mubr.f32.mxu0 %v6386_v5 }
 0x160   : > { %v3067_v56 = vmul.f32 %v3027_v27, %v5977_v10  ;;  %v3066_v12 = vmul.f32 %v3023_v20, %v5980_v13  ;;  %5239 = vmatprep.subr.bf16.mxu0 %v5238_v32  ;;  %v6850_v27 = vld [vmem:[%s5860_s24 + $0x1a0] sm:$0xff] }
 0x161   : > { %4829 = vmatmul.mubr.f32.gmra.mrb[20].mxu0 %v6389_v8 }
 0x162   : > { %v5242_v49 = vpack.c.bf16 %v3067_v56, %v3066_v12  ;;  %4485 = vmatmul.mubr.f32.gmra.mrb[4].mxu1 %v7369_v50  ;;  %5241 = vmatpush3.bf16.msra.mxu0 %v5238_v32 }
 0x163   : > { %v3035_v63 = vpop.permute.xlu1 %3034  ;;  %v3031_v34 = vpop.permute.xlu0 %3030  ;;  %4487 = vmatprep.mubr.f32.mxu1 %v7370_v40  ;;  %4831 = vmatprep.mubr.f32.mxu0 %v6425_v17 }
 0x164   : > { %v3069_v0 = vmul.f32 %v3035_v63, %v6001_v37  ;;  %v3068_v5 = vmul.f32 %v3031_v34, %v6004_v38  ;;  %5243 = vmatprep.subr.bf16.mxu0 %v5242_v49 }
 0x165   : > { %4832 = vmatmul.mubr.f32.gmra.mrb[22].mxu0 %v6428_v18 }
 0x166   : > { %v5246_v59 = vpack.c.bf16 %v3069_v0, %v3068_v5  ;;  %4488 = vmatmul.mubr.f32.gmra.mrb[6].mxu1 %v7371_v48  ;;  %5245 = vmatpush3.bf16.msra.mxu0 %v5242_v49  ;;  %v7375_v5 = vld [vmem:[#allocation19_spill] sm:$0xff] }
 0x167   : > { %v3043_v8 = vpop.permute.xlu1 %3042  ;;  %v3039_v19 = vpop.permute.xlu0 %3038  ;;  %4490 = vmatprep.mubr.f32.mxu1 %v7372_v15  ;;  %4834 = vmatprep.mubr.f32.mxu0 %v6460_v33 }
 0x168   : > { %v3071_v6 = vmul.f32 %v3043_v8, %v6025_v54  ;;  %v3070_v17 = vmul.f32 %v3039_v19, %v6028_v55  ;;  %5247 = vmatprep.subr.bf16.mxu0 %v5246_v59  ;;  %v7376_v19 = vld [vmem:[#allocation21_spill] sm:$0xff] }
 0x169   : > { %4835 = vmatmul.mubr.f32.gmra.mrb[24].mxu0 %v6463_v3 }
 0x16a   : > { %v5250_v26 = vpack.c.bf16 %v3071_v6, %v3070_v17  ;;  %4491 = vmatmul.mubr.f32.gmra.mrb[8].mxu1 %v7373_v61  ;;  %5249 = vmatpush3.bf16.msra.mxu0 %v5246_v59  ;;  %v7377_v17 = vld [vmem:[#allocation22_spill] sm:$0xff] }
 0x16b   : > { %v3051_v18 = vpop.permute.xlu1 %3050  ;;  %v3047_v39 = vpop.permute.xlu0 %3046  ;;  %4493 = vmatprep.mubr.f32.mxu1 %v7374_v62  ;;  %4837 = vmatprep.mubr.f32.mxu0 %v6496_v1 }
 0x16c   : > { %v3073_v33 = vmul.f32 %v3051_v18, %v6053_v21  ;;  %v3072_v9 = vmul.f32 %v3047_v39, %v6056_v23  ;;  %5251 = vmatprep.subr.bf16.mxu0 %v5250_v26  ;;  %v7378_v39 = vld [vmem:[#allocation63_spill] sm:$0xff] }
 0x16d   : > { %4838 = vmatmul.mubr.f32.gmra.mrb[26].mxu0 %v6499_v11 }
 0x16e   : > { %v5254_v3 = vpack.c.bf16 %v3073_v33, %v3072_v9  ;;  %4494 = vmatmul.mubr.f32.gmra.mrb[10].mxu1 %v6477_v2  ;;  %5253 = vmatpush3.bf16.msra.mxu0 %v5250_v26 }
 0x16f   : > { %v3059_v7 = vpop.permute.xlu1 %3058  ;;  %v3055_v41 = vpop.permute.xlu0 %3054  ;;  %4496 = vmatprep.mubr.f32.mxu1 %v6490_v53  ;;  %4840 = vmatprep.mubr.f32.mxu0 %v6673_v52 }
 0x170   : > { %v3075_v1 = vmul.f32 %v3059_v7, %v6077_v43  ;;  %v3074_v32 = vmul.f32 %v3055_v41, %v6080_v45  ;;  %5255 = vmatprep.subr.bf16.mxu0 %v5254_v3  ;;  %v7380_v41 = vld [vmem:[#allocation26_spill] sm:$0xff] }
 0x171   : > { %4841 = vmatmul.mubr.f32.gmra.mrb[28].mxu0 %v6676_v22 }
 0x172   : > { %v5258_v11 = vpack.c.bf16 %v3075_v1, %v3074_v32  ;;  %4497 = vmatmul.mubr.f32.gmra.mrb[12].mxu1 %v6509_v47  ;;  %5257 = vmatpush3.bf16.msra.mxu0 %v5254_v3  ;;  %v7379_v3 = vld [vmem:[#allocation23_spill] sm:$0xff] }
 0x173   : > { %v1626_v20 = vpop.permute.xlu1 %1625  ;;  %v1622_v56 = vpop.permute.xlu0 %1621  ;;  %4499 = vmatprep.mubr.f32.mxu1 %v6525_v4  ;;  %4843 = vmatprep.mubr.f32.mxu0 %v6845_v25 }
 0x174   : > { %v1684_v12 = vmul.f32 %v1626_v20, %v5910_v30  ;;  %v1683_v49 = vmul.f32 %v1622_v56, %v5907_v29  ;;  %5259 = vmatprep.subr.bf16.mxu0 %v5258_v11 }
 0x175   : > { %4844 = vmatmul.mubr.f32.gmra.mrb[30].mxu0 %v6850_v27 }
 0x176   : > { %v5102_v63 = vpack.c.bf16 %v1684_v12, %v1683_v49  ;;  %4500 = vmatmul.mubr.f32.gmra.mrb[14].mxu1 %v6538_v31  ;;  %5261 = vmatpush3.bf16.msra.mxu0 %v5258_v11  ;;  %v7381_v11 = vld [vmem:[#allocation64_spill] sm:$0xff]  ;;  %v7382_v12 = vld [vmem:[#allocation29_spill] sm:$0xff] }
 0x177   : > { %v1634_v34 = vpop.permute.xlu1 %1633  ;;  %v1630_v0 = vpop.permute.xlu0 %1629  ;;  %4502 = vmatprep.mubr.f32.mxu1 %v6552_v42  ;;  %4878 = vmatprep.mubr.f32.mxu0 %v7375_v5 }
 0x178   : > { %v1686_v59 = vmul.f32 %v1634_v34, %v5919_v35  ;;  %v1685_v8 = vmul.f32 %v1630_v0, %v5922_v36  ;;  %5103 = vmatprep.subr.bf16.mxu1 %v5102_v63  ;;  %v7384_v34 = vld [vmem:[#allocation30_spill] sm:$0xff] }
 0x179   : > { %4879 = vmatmul.mubr.f32.vlgmr.msra.gmra.mrb[0].mxu0 %v7376_v19  ;;  %5105 = vmatpush3.bf16.msra.mxu1 %v5102_v63  ;;  %v7383_v63 = vld [vmem:[#allocation65_spill] sm:$0xff] }
 0x17a   : > { %v5106_v6 = vpack.c.bf16 %v1686_v59, %v1685_v8  ;;  %4503 = vmatmul.mubr.f32.gmra.mrb[16].mxu1 %v6561_v44  ;;  %4881 = vmatprep.mubr.f32.mxu0 %v7377_v17  ;;  %v7385_v59 = vld [vmem:[#allocation66_spill] sm:$0xff] }
 0x17b   : > { %v1642_v26 = vpop.permute.xlu1 %1641  ;;  %v1638_v18 = vpop.permute.xlu0 %1637  ;;  %4505 = vmatprep.mubr.f32.mxu1 %v7378_v39 }
 0x17c   : > { %v1688_v33 = vmul.f32 %v1642_v26, %v5953_v57  ;;  %v1687_v9 = vmul.f32 %v1638_v18, %v5956_v58  ;;  %5107 = vmatprep.subr.bf16.mxu1 %v5106_v6  ;;  %v7387_v26 = vld [vmem:[#allocation34_spill] sm:$0xff] }
 0x17d   : > { %4882 = vmatmul.mubr.f32.gmra.mrb[2].mxu0 %v7379_v3  ;;  %5109 = vmatpush3.bf16.msra.mxu1 %v5106_v6  ;;  %v7386_v6 = vld [vmem:[#allocation31_spill] sm:$0xff] }
 0x17e   : > { %v5110_v7 = vpack.c.bf16 %v1688_v33, %v1687_v9  ;;  %4506 = vmatmul.mubr.f32.gmra.mrb[18].mxu1 %v6582_v28  ;;  %4884 = vmatprep.mubr.f32.mxu0 %v7380_v41  ;;  %v7388_v9 = vld [vmem:[#allocation5_spill] sm:$0xff]  ;;  %v7389_v41 = vld [vmem:[#allocation35_spill] sm:$0xff] }
 0x17f   : > { %v1650_v1 = vpop.permute.xlu1 %1649  ;;  %v1646_v32 = vpop.permute.xlu0 %1645  ;;  %4508 = vmatprep.mubr.f32.mxu1 %v7381_v11 }
 0x180   : > { %v1690_v20 = vmul.f32 %v1650_v1, %v5977_v10  ;;  %v1689_v56 = vmul.f32 %v1646_v32, %v5980_v13  ;;  %5111 = vmatprep.subr.bf16.mxu1 %v5110_v7  ;;  %v7390_v32 = vld [vmem:[#allocation7_spill] sm:$0xff] }
 0x181   : > { %4885 = vmatmul.mubr.f32.gmra.mrb[4].mxu0 %v7382_v12  ;;  %5113 = vmatpush3.bf16.msra.mxu1 %v5110_v7  ;;  %v7392_v12 = vld [vmem:[#allocation14_spill] sm:$0xff] }
 0x182   : > { %v5114_v49 = vpack.c.bf16 %v1690_v20, %v1689_v56  ;;  %4509 = vmatmul.mubr.f32.gmra.mrb[20].mxu1 %v7383_v63  ;;  %4887 = vmatprep.mubr.f32.mxu0 %v7384_v34  ;;  %v7391_v20 = vld [vmem:[#allocation36_spill] sm:$0xff] }
 0x183   : > { %v1658_v0 = vpop.permute.xlu1 %1657  ;;  %v1654_v5 = vpop.permute.xlu0 %1653  ;;  %4511 = vmatprep.mubr.f32.mxu1 %v7385_v59 }
 0x184   : > { %v1692_v8 = vmul.f32 %v1658_v0, %v6001_v37  ;;  %v1691_v19 = vmul.f32 %v1654_v5, %v6004_v38  ;;  %5115 = vmatprep.subr.bf16.mxu1 %v5114_v49  ;;  %v7393_v5 = vld [vmem:[#allocation37_spill] sm:$0xff] }
 0x185   : > { %4888 = vmatmul.mubr.f32.gmra.mrb[6].mxu0 %v7386_v6  ;;  %5117 = vmatpush3.bf16.msra.mxu1 %v5114_v49 }
 0x186   : > { %v5118_v17 = vpack.c.bf16 %v1692_v8, %v1691_v19  ;;  %4512 = vmatmul.mubr.f32.gmra.mrb[22].mxu1 %v6620_v60  ;;  %4890 = vmatprep.mubr.f32.mxu0 %v7387_v26  ;;  %v7394_v8 = vld [vmem:[#allocation15_spill] sm:$0xff]  ;;  %v7395_v19 = vld [vmem:[#allocation38_spill] sm:$0xff]  ;;  %v7396_v26 = vld [vmem:[#allocation17_spill] sm:$0xff] }
 0x187   : > { %v1666_v18 = vpop.permute.xlu1 %1665  ;;  %v1662_v33 = vpop.permute.xlu0 %1661  ;;  %4514 = vmatprep.mubr.f32.mxu1 %v7388_v9 }
 0x188   : > { %v1694_v3 = vmul.f32 %v1666_v18, %v6025_v54  ;;  %v1693_v7 = vmul.f32 %v1662_v33, %v6028_v55  ;;  %5119 = vmatprep.subr.bf16.mxu1 %v5118_v17 }
 0x189   : > { %4891 = vmatmul.mubr.f32.gmra.mrb[8].mxu0 %v7389_v41  ;;  %5121 = vmatpush3.bf16.msra.mxu1 %v5118_v17  ;;  %v7398_v41 = vld [vmem:[#allocation18_spill] sm:$0xff] }
 0x18a   : > { %v5122_v1 = vpack.c.bf16 %v1694_v3, %v1693_v7  ;;  %4515 = vmatmul.mubr.f32.gmra.mrb[24].mxu1 %v7390_v32  ;;  %4893 = vmatprep.mubr.f32.mxu0 %v7391_v20  ;;  %v7397_v7 = vld [vmem:[#allocation39_spill] sm:$0xff]  ;;  %v7399_v20 = vld [vmem:[#allocation42_spill] sm:$0xff] }
 0x18b   : > { %v1674_v56 = vpop.permute.xlu1 %1673  ;;  %4517 = vmatprep.mubr.f32.mxu1 %v7392_v12 }
 0x18c   : > { %v1696_v49 = vmul.f32 %v1674_v56, %v6053_v21  ;;  %v1670_v34 = vpop.permute.xlu0 %1669  ;;  %5123 = vmatprep.subr.bf16.mxu1 %v5122_v1 }
 0x18d   : > { %v1695_v0 = vmul.f32 %v1670_v34, %v6056_v23  ;;  %4894 = vmatmul.mubr.f32.gmra.mrb[10].mxu0 %v7393_v5  ;;  %5125 = vmatpush3.bf16.msra.mxu1 %v5122_v1  ;;  %v7400_v5 = vld [vmem:[#allocation44_spill] sm:$0xff] }
 0x18e   : > { %4518 = vmatmul.mubr.f32.gmra.mrb[26].mxu1 %v7394_v8  ;;  %4896 = vmatprep.mubr.f32.mxu0 %v7395_v19  ;;  %v7401_v19 = vld [vmem:[#allocation46_spill] sm:$0xff] }
 0x18f   : > { %v5126_v6 = vpack.c.bf16 %v1696_v49, %v1695_v0  ;;  %v1682_v17 = vpop.permute.xlu1 %1681  ;;  %4520 = vmatprep.mubr.f32.mxu1 %v7396_v26 }
 0x190   : > { %v1698_v18 = vmul.f32 %v1682_v17, %v6077_v43  ;;  %v1678_v33 = vpop.permute.xlu0 %1677 }
 0x191   : > { %v1697_v3 = vmul.f32 %v1678_v33, %v6080_v45  ;;  %5127 = vmatprep.subr.bf16.mxu1 %v5126_v6  ;;  %4897 = vmatmul.mubr.f32.gmra.mrb[12].mxu0 %v7397_v7 }
 0x192   : > { %4521 = vmatmul.mubr.f32.gmra.mrb[28].mxu1 %v7398_v41  ;;  %4899 = vmatprep.mubr.f32.mxu0 %v7399_v20 }
 0x193   : > { %v5130_v1 = vpack.c.bf16 %v1698_v18, %v1697_v3  ;;  %5129 = vmatpush3.bf16.msra.mxu1 %v5126_v6  ;;  %v3353_v56 = vpop.permute.xlu1 %3352  ;;  %4523 = vmatprep.mubr.f32.mxu1 %v6690_v51  ;;  %v7402_v18 = vld [vmem:[#allocation67_spill] sm:$0xff]  ;;  %v7403_v6 = vld [vmem:[#allocation6_spill] sm:$0xff] }
 0x194   : > { %v3411_v49 = vmul.f32 %v3353_v56, %v5910_v30  ;;  %v3349_v34 = vpop.permute.xlu0 %3348  ;;  %v7405_v56 = vld [vmem:[#allocation68_spill] sm:$0xff] }
 0x195   : > { %v3410_v0 = vmul.f32 %v3349_v34, %v5907_v29  ;;  %5131 = vmatprep.subr.bf16.mxu1 %v5130_v1  ;;  %4900 = vmatmul.mubr.f32.gmra.mrb[14].mxu0 %v7400_v5  ;;  %v7404_v29 = vld [vmem:[#allocation48_spill] sm:$0xff] }
 0x196   : > { %4524 = vmatmul.mubr.f32.gmra.mrb[30].mxu1 %v6704_v24  ;;  %4902 = vmatprep.mubr.f32.mxu0 %v7401_v19 }
 0x197   : > { %v5262_v17 = vpack.c.bf16 %v3411_v49, %v3410_v0  ;;  %5133 = vmatpush3.bf16.msra.mxu1 %v5130_v1  ;;  %v3361_v33 = vpop.permute.xlu1 %3360  ;;  %4558 = vmatprep.mubr.f32.mxu1 %v7402_v18  ;;  %v7406_v49 = vld [vmem:[#allocation28_spill] sm:$0xff] }
 0x198   : > { %5294 = vmatprep.subr.bf16.mxu1 %v7403_v6  ;;  %v3413_v3 = vmul.f32 %v3361_v33, %v5919_v35  ;;  %v3357_v30 = vpop.permute.xlu0 %3356  ;;  %v7407_v0 = vld [vmem:[#allocation8_spill] sm:$0xff]  ;;  %v7408_v33 = vld [vmem:[#allocation50_spill] sm:$0xff] }
 0x199   : > { %v3412_v7 = vmul.f32 %v3357_v30, %v5922_v36  ;;  %4903 = vmatmul.mubr.f32.gmra.mrb[16].mxu0 %v7404_v29  ;;  %5263 = vmatprep.subr.bf16.mxu0 %v5262_v17  ;;  %v7409_v30 = vld [vmem:[#allocation52_spill] sm:$0xff] }
 0x19a   : > { %4559 = vmatmul.mubr.f32.vlgmr.msra.gmra.mrb[0].mxu1 %v7405_v56  ;;  %5265 = vmatpush3.bf16.msra.mxu0 %v5262_v17  ;;  %v7410_v56 = vld [vmem:[#allocation32_spill] sm:$0xff] }
 0x19b   : > { %v5266_v34 = vpack.c.bf16 %v3413_v3, %v3412_v7  ;;  %5302 = vmatpush3.bf16.msra.mxu1 %v7403_v6  ;;  %v3369_v1 = vpop.permute.xlu1 %3368  ;;  %4561 = vmatprep.mubr.f32.mxu1 %v7406_v49  ;;  %v7411_v3 = vld [vmem:[#allocation33_spill] sm:$0xff]  ;;  %v7413_v49 = vld [vmem:[#allocation54_spill] sm:$0xff] }
 0x19c   : > { %5295 = vmatprep.subr.bf16.mxu1 %v7407_v0  ;;  %v3415_v18 = vmul.f32 %v3369_v1, %v5953_v57  ;;  %v3365_v35 = vpop.permute.xlu0 %3364  ;;  %4905 = vmatprep.mubr.f32.mxu0 %v7408_v33  ;;  %v7412_v7 = vld [vmem:[#allocation9_spill] sm:$0xff] }
 0x19d   : > { %v3414_v36 = vmul.f32 %v3365_v35, %v5956_v58  ;;  %4906 = vmatmul.mubr.f32.gmra.mrb[18].mxu0 %v7409_v30  ;;  %5267 = vmatprep.subr.bf16.mxu0 %v5266_v34  ;;  %v7414_v35 = vld [vmem:[#allocation56_spill] sm:$0xff] }
 0x19e   : > { %4562 = vmatmul.mubr.f32.gmra.mrb[2].mxu1 %v7410_v56  ;;  %5269 = vmatpush3.bf16.msra.mxu0 %v5266_v34 }
 0x19f   : > { %v5270_v17 = vpack.c.bf16 %v3415_v18, %v3414_v36  ;;  %5303 = vmatpush3.bf16.msra.mxu1 %v7407_v0  ;;  %v3377_v6 = vpop.permute.xlu1 %3376  ;;  %4564 = vmatprep.mubr.f32.mxu1 %v7411_v3  ;;  %v7415_v18 = vld [vmem:[#allocation69_spill] sm:$0xff]  ;;  %v7416_v36 = vld [vmem:[#allocation10_spill] sm:$0xff] }
 0x1a0   : > { %5296 = vmatprep.subr.bf16.mxu1 %v7412_v7  ;;  %v3417_v57 = vmul.f32 %v3377_v6, %v5977_v10  ;;  %v3373_v1 = vpop.permute.xlu0 %3372  ;;  %4908 = vmatprep.mubr.f32.mxu0 %v7413_v49  ;;  %v7417_v6 = vld [vmem:[#allocation57_spill] sm:$0xff]  ;;  %v7418_v3 = vld [vmem:[#allocation58_spill] sm:$0xff] }
 0x1a1   : > { %v3416_v58 = vmul.f32 %v3373_v1, %v5980_v13  ;;  %4909 = vmatmul.mubr.f32.gmra.mrb[20].mxu0 %v7414_v35  ;;  %5271 = vmatprep.subr.bf16.mxu0 %v5270_v17  ;;  %v7420_v1 = vld [vmem:[#allocation59_spill] sm:$0xff] }
 0x1a2   : > { %4565 = vmatmul.mubr.f32.gmra.mrb[4].mxu1 %v6754_v14  ;;  %5273 = vmatpush3.bf16.msra.mxu0 %v5270_v17 }
 0x1a3   : > { %v5274_v34 = vpack.c.bf16 %v3417_v57, %v3416_v58  ;;  %5304 = vmatpush3.bf16.msra.mxu1 %v7412_v7  ;;  %v3385_v0 = vpop.permute.xlu1 %3384  ;;  %4567 = vmatprep.mubr.f32.mxu1 %v7415_v18  ;;  %v5635_v7 = vld [vmem:[%s5860_s24 + $0x78] sm:$0xff]  ;;  %v7419_v57 = vld [vmem:[#allocation11_spill] sm:$0xff]  ;;  %v5636_v18 = vld [vmem:[%s5860_s24 + $0x80] sm:$0xff] }
 0x1a4   : > { %5297 = vmatprep.subr.bf16.mxu1 %v7416_v36  ;;  %v3419_v10 = vmul.f32 %v3385_v0, %v6001_v37  ;;  %v3381_v56 = vpop.permute.xlu0 %3380  ;;  %4911 = vmatprep.mubr.f32.mxu0 %v7417_v6  ;;  %v2043_v0 = vrot.slane %v6676_v22, 1 }
 0x1a5   : > { %v3418_v13 = vmul.f32 %v3381_v56, %v6004_v38  ;;  %4912 = vmatmul.mubr.f32.gmra.mrb[22].mxu0 %v7418_v3  ;;  %5275 = vmatprep.subr.bf16.mxu0 %v5274_v34 }
 0x1a6   : > { %4568 = vmatmul.mubr.f32.gmra.mrb[6].mxu1 %v6768_v46  ;;  %5277 = vmatpush3.bf16.msra.mxu0 %v5274_v34  ;;  %v7421_v46 = vld [vmem:[#allocation60_spill] sm:$0xff]  ;;  %v2042_v34 = vrot.slane %v6673_v52, 1 }
 0x1a7   : > { %v5278_v14 = vpack.c.bf16 %v3419_v10, %v3418_v13  ;;  %5305 = vmatpush3.bf16.msra.mxu1 %v7416_v36  ;;  %v3393_v17 = vpop.permute.xlu1 %3392  ;;  %4570 = vmatprep.mubr.f32.mxu1 %v5635_v7  ;;  %v7422_v36 = vld [vmem:[#allocation20_spill] sm:$0xff]  ;;  %v6951_v13 = vld [vmem:[%s5860_s24 + $0x1a8] sm:$0x3] }
 0x1a8   : > { %5298 = vmatprep.subr.bf16.mxu1 %v7419_v57  ;;  %v3421_v37 = vmul.f32 %v3393_v17, %v6025_v54  ;;  %v3389_v38 = vpop.permute.xlu0 %3388  ;;  %4914 = vmatprep.mubr.f32.mxu0 %v7420_v1  ;;  %v2045_v10 = vrot.slane %v7422_v36, 1  ;;  %v5637_v54 = vld [vmem:[%s5860_s24 + $0x90] sm:$0xff]  ;;  %v7423_v17 = vld [vmem:[#allocation12_spill] sm:$0xff] }
 0x1a9   : > { %v3420_v58 = vmul.f32 %v3389_v38, %v6028_v55  ;;  %4915 = vmatmul.mubr.f32.gmra.mrb[24].mxu0 %v7421_v46  ;;  %5279 = vmatprep.subr.bf16.mxu0 %v5278_v14  ;;  %v3079_v55 = vrot.slane %v6845_v25, 1  ;;  %v7424_v46 = vld [vmem:[#allocation61_spill] sm:$0xff]  ;;  %v5638_v36 = vld [vmem:[%s5860_s24 + $0x98] sm:$0xff] }
 0x1aa   : > { %4571 = vmatmul.mubr.f32.gmra.mrb[8].mxu1 %v5636_v18  ;;  %5281 = vmatpush3.bf16.msra.mxu0 %v5278_v14  ;;  %v3080_v14 = vrot.slane %v6850_v27, 1  ;;  %v6961_v18 = vsel %vm600_vm0, %v2042_v34, %v2043_v0 }
 0x1ab   : > { %v5282_v56 = vpack.c.bf16 %v3421_v37, %v3420_v58  ;;  %5306 = vmatpush3.bf16.msra.mxu1 %v7419_v57  ;;  %4573 = vmatprep.mubr.f32.mxu1 %v5637_v54  ;;  %v7425_v57 = vld [vmem:[#allocation62_spill] sm:$0xff]  ;;  %v6965_v54 = vsel %vm600_vm0, %v2043_v0, %v2045_v10  ;;  %v5640_v10 = vld [vmem:[%s5860_s24 + $0xb0] sm:$0xff] }
 0x1ac   : > { %5299 = vmatprep.subr.bf16.mxu1 %v7423_v17  ;;  %v3401_v7 = vpop.permute.xlu1 %3400  ;;  %v3397_v38 = vpop.permute.xlu0 %3396  ;;  %4917 = vmatprep.mubr.f32.mxu0 %v7424_v46  ;;  %v3082_v46 = vrot.slane %v6951_v13, 1  ;;  %v3081_v0 = vsel %vm600_vm0, %v3079_v55, %v3080_v14  ;;  %v5645_v55 = vld [vmem:[%s5860_s24 + $0xf0] sm:$0xff] }
 0x1ad   : > { %v3423_v37 = vmul.f32 %v3401_v7, %v6053_v21  ;;  %v3422_v58 = vmul.f32 %v3397_v38, %v6056_v23  ;;  %4918 = vmatmul.mubr.f32.gmra.mrb[26].mxu0 %v7425_v57  ;;  %5283 = vmatprep.subr.bf16.mxu0 %v5282_v56  ;;  %v5639_v21 = vld [vmem:[%s5860_s24 + $0xa8] sm:$0xff]  ;;  %v7426_v23 = vld [vmem:[#allocation13_spill] sm:$0xff] }
 0x1ae   : > { %4574 = vmatmul.mubr.f32.gmra.mrb[10].mxu1 %v5638_v36  ;;  %5285 = vmatpush3.bf16.msra.mxu0 %v5282_v56  ;;  %v5647_v36 = vld [vmem:[%s5860_s24 + $0x108] sm:$0xff] }
 0x1af   : > { %v5286_v24 = vpack.c.bf16 %v3423_v37, %v3422_v58  ;;  %5307 = vmatpush3.bf16.msra.mxu1 %v7423_v17  ;;  %4576 = vmatprep.mubr.f32.mxu1 %v5639_v21  ;;  %v3083_v17 = vsel %vm600_vm0, %v3080_v14, %v3082_v46  ;;  %v5641_v58 = vld [vmem:[%s5860_s24 + $0xc0] sm:$0xff]  ;;  %v5646_v14 = vld [vmem:[%s5860_s24 + $0xf8] sm:$0xff] }
 0x1b0   : > { %5300 = vmatprep.subr.bf16.mxu1 %v7426_v23  ;;  %v3409_v7 = vpop.permute.xlu1 %3408  ;;  %v3405_v34 = vpop.permute.xlu0 %3404  ;;  %4920 = vmatprep.mubr.f32.mxu0 %v6961_v18  ;;  %v5644_v46 = vld [vmem:[%s5860_s24 + $0xe0] sm:$0xff] }
 0x1b1   : > { %v3425_v56 = vmul.f32 %v3409_v7, %v6077_v43  ;;  %v3424_v38 = vmul.f32 %v3405_v34, %v6080_v45  ;;  %4921 = vmatmul.mubr.f32.gmra.mrb[28].mxu0 %v6965_v54  ;;  %5287 = vmatprep.subr.bf16.mxu0 %v5286_v24  ;;  %v7427_v43 = vld [vmem:[#allocation16_spill] sm:$0xff]  ;;  %v5642_v45 = vld [vmem:[%s5860_s24 + $0xc8] sm:$0xff] }
 0x1b2   : > { %4577 = vmatmul.mubr.f32.gmra.mrb[12].mxu1 %v5640_v10  ;;  %5289 = vmatpush3.bf16.msra.mxu0 %v5286_v24  ;;  %v5643_v24 = vld [vmem:[%s5860_s24 + $0xd8] sm:$0xff] }
 0x1b3   : > { %v5290_v37 = vpack.c.bf16 %v3425_v56, %v3424_v38  ;;  %5308 = vmatpush3.bf16.msra.mxu1 %v7426_v23  ;;  %4579 = vmatprep.mubr.f32.mxu1 %v5641_v58 }
 0x1b4   : > { %5301 = vmatprep.subr.bf16.mxu1 %v7427_v43  ;;  %4923 = vmatprep.mubr.f32.mxu0 %v3081_v0 }
 0x1b5   : > { %4924 = vmatmul.mubr.f32.gmra.mrb[30].mxu0 %v3083_v17  ;;  %5291 = vmatprep.subr.bf16.mxu0 %v5290_v37 }
 0x1b6   : > { %4580 = vmatmul.mubr.f32.gmra.mrb[14].mxu1 %v5642_v45  ;;  %5293 = vmatpush3.bf16.msra.mxu0 %v5290_v37 }
 0x1b7   : > { %5309 = vmatpush3.bf16.msra.mxu1 %v7427_v43  ;;  %4582 = vmatprep.mubr.f32.mxu1 %v5643_v24 }
 0x1b8   : > { %4958 = vmatprep.mubr.f32.mxu0 %v7368_v16  ;;  %v5648_v16 = vld [vmem:[%s5860_s24 + $0x110] sm:$0xff] }
 0x1b9   : > { %4959 = vmatmul.mubr.f32.vlgmr.msra.gmra.mrb[0].mxu0 %v7369_v50  ;;  %v5649_v50 = vld [vmem:[%s5860_s24 + $0x120] sm:$0xff] }
 0x1ba   : > { %4583 = vmatmul.mubr.f32.gmra.mrb[16].mxu1 %v5644_v46  ;;  %4961 = vmatprep.mubr.f32.mxu0 %v7370_v40  ;;  %v5650_v40 = vld [vmem:[%s5860_s24 + $0x128] sm:$0xff] }
 0x1bb   : > { %4585 = vmatprep.mubr.f32.mxu1 %v5645_v55 }
 0x1bd   : > { %4962 = vmatmul.mubr.f32.gmra.mrb[2].mxu0 %v7371_v48  ;;  %v5651_v48 = vld [vmem:[%s5860_s24 + $0x138] sm:$0xff] }
 0x1be   : > { %4586 = vmatmul.mubr.f32.gmra.mrb[18].mxu1 %v5646_v14  ;;  %4964 = vmatprep.mubr.f32.mxu0 %v7372_v15  ;;  %v5652_v15 = vld [vmem:[%s5860_s24 + $0x140] sm:$0xff] }
 0x1bf   : > { %4588 = vmatprep.mubr.f32.mxu1 %v5647_v36 }
 0x1c1   : > { %4965 = vmatmul.mubr.f32.gmra.mrb[4].mxu0 %v7373_v61  ;;  %v5653_v61 = vld [vmem:[%s5860_s24 + $0x150] sm:$0xff] }
 0x1c2   : > { %4589 = vmatmul.mubr.f32.gmra.mrb[20].mxu1 %v5648_v16  ;;  %4967 = vmatprep.mubr.f32.mxu0 %v7374_v62  ;;  %v5654_v62 = vld [vmem:[%s5860_s24 + $0x158] sm:$0xff] }
 0x1c3   : > { %4591 = vmatprep.mubr.f32.mxu1 %v5649_v50 }
 0x1c5   : > { %4968 = vmatmul.mubr.f32.gmra.mrb[6].mxu0 %v6477_v2  ;;  %v5655_v2 = vld [vmem:[%s5860_s24 + $0x168] sm:$0xff] }
 0x1c6   : > { %4592 = vmatmul.mubr.f32.gmra.mrb[22].mxu1 %v5650_v40  ;;  %4970 = vmatprep.mubr.f32.mxu0 %v6490_v53  ;;  %v5656_v53 = vld [vmem:[%s5860_s24 + $0x170] sm:$0xff]  ;;  %s261_s24 = sand.u32 1, %s5719_s19  }
 0x1c7   : > { %4594 = vmatprep.mubr.f32.mxu1 %v5651_v48  ;;  %s3844_s13 = sshll.u32 %s261_s24, 8  ;;  %s7098_s21 = scalar_lea.sflag [#allocation3], %s261_s24 }
 0x1c8   : > { %s7053_s14 = scalar_lea.vmem [#allocation2], %s3844_s13 }
 0x1c9   : > { %4971 = vmatmul.mubr.f32.gmra.mrb[8].mxu0 %v6509_v47  ;;  %v3426_v47 = vrot.slane %v6845_v25, 2  ;;  %s3739_s16 = sshll.u32 %s7053_s14, 4  ;;  %s7092_s16 = int_to_ptr.vmem [resolvable:$true] %s3739_s16 }
 0x1ca   : > { %4595 = vmatmul.mubr.f32.gmra.mrb[24].mxu1 %v5652_v15  ;;  %4973 = vmatprep.mubr.f32.mxu0 %v6525_v4  ;;  %v3427_v4 = vrot.slane %v6850_v27, 2  ;;  %s5657_s29 = scalar_lea.vmem %s7092_s16, 4096  ;;  %p5664_p1 = scmp.lt.s32.totalorder %s7092_s16, %s5662_s9 }
 0x1cb   : > { %4597 = vmatprep.mubr.f32.mxu1 %v5653_v61  ;;  %p5658_p12 = scmp.ne.s32.totalorder %s7092_s16, %s5657_s29  ;;  %p5665_p2 = scmp.lt.s32.totalorder %s5663_s10, %s5657_s29 }
 0x1cd   : > { %4974 = vmatmul.mubr.f32.gmra.mrb[10].mxu0 %v6538_v31  ;;  %v7428_v31 = vld [vmem:[#allocation24_spill] sm:$0xff]  ;;  %p5659_p13 = pnand %p5658_p12, %p5810_p4  ;;  %p5666_p3 = por %p5665_p2, %p5664_p1 }
 0x1ce   : > { %4598 = vmatmul.mubr.f32.gmra.mrb[26].mxu1 %v5654_v62  ;;  %4976 = vmatprep.mubr.f32.mxu0 %v6552_v42  ;;  %v7429_v42 = vld [vmem:[#allocation60_spill] sm:$0xff] }
 0x1cf   : > { %4600 = vmatprep.mubr.f32.mxu1 %v5655_v2  ;;  %p5660_p0 = pneg %p5659_p13 }
 0x1d1   : > { %4977 = vmatmul.mubr.f32.gmra.mrb[12].mxu0 %v6561_v44  ;;  %v7430_v44 = vld [vmem:[#allocation25_spill] sm:$0xff]  ;;  %p5667_p5 = pnand %p5666_p3, %p5660_p0 }
 0x1d2   : > { %4601 = vmatmul.mubr.f32.gmra.mrb[28].mxu1 %v5656_v53  ;;  %4979 = vmatprep.mubr.f32.mxu0 %v7378_v39 }
 0x1d3   : > { %4603 = vmatprep.mubr.f32.mxu1 %v6673_v52  ;;  %v3428_v52 = vsel %vm1246_vm1, %v3426_v47, %v3427_v4 }
 0x1d5   : > { %4980 = vmatmul.mubr.f32.gmra.mrb[14].mxu0 %v6582_v28  ;;  %v3429_v28 = vrot.slane %v6951_v13, 2 }
 0x1d6   : > { %4604 = vmatmul.mubr.f32.gmra.mrb[30].mxu1 %v6676_v22  ;;  %4982 = vmatprep.mubr.f32.mxu0 %v7381_v11  ;;  %v7432_v22 = vld [vmem:[#allocation27_spill] sm:$0xff] }
 0x1d7   : > { %4662 = vmatprep.mubr.f32.mxu1 %v7399_v20 }
 0x1d9   : > { %4983 = vmatmul.mubr.f32.gmra.mrb[16].mxu0 %v7383_v63 }
 0x1da   : > { %4663 = vmatmul.mubr.f32.vlgmr.msra.gmra.mrb[16].mxu1 %v7400_v5  ;;  %4985 = vmatprep.mubr.f32.mxu0 %v7385_v59 }
 0x1db   : > { %4665 = vmatprep.mubr.f32.mxu1 %v7401_v19 }
 0x1dd   : > { %4986 = vmatmul.mubr.f32.gmra.mrb[18].mxu0 %v6620_v60  ;;  %v7431_v60 = vld [vmem:[#allocation61_spill] sm:$0xff] }
 0x1de   : > { %4666 = vmatmul.mubr.f32.gmra.mrb[18].mxu1 %v7404_v29  ;;  %4988 = vmatprep.mubr.f32.mxu0 %v7388_v9 }
 0x1df   : > { %4668 = vmatprep.mubr.f32.mxu1 %v7408_v33 }
 0x1e1   : > { %4989 = vmatmul.mubr.f32.gmra.mrb[20].mxu0 %v7390_v32 }
 0x1e2   : > { %4669 = vmatmul.mubr.f32.gmra.mrb[20].mxu1 %v7409_v30  ;;  %4991 = vmatprep.mubr.f32.mxu0 %v7392_v12 }
 0x1e3   : > { %4671 = vmatprep.mubr.f32.mxu1 %v7413_v49 }
 0x1e5   : > { %4992 = vmatmul.mubr.f32.gmra.mrb[22].mxu0 %v7394_v8 }
 0x1e6   : > { %4672 = vmatmul.mubr.f32.gmra.mrb[22].mxu1 %v7414_v35  ;;  %4994 = vmatprep.mubr.f32.mxu0 %v7396_v26 }
 0x1e7   : > { %4674 = vmatprep.mubr.f32.mxu1 %v7417_v6 }
 0x1e9   : > { %4995 = vmatmul.mubr.f32.gmra.mrb[24].mxu0 %v7398_v41 }
 0x1ea   : > { %4675 = vmatmul.mubr.f32.gmra.mrb[24].mxu1 %v7418_v3  ;;  %4997 = vmatprep.mubr.f32.mxu0 %v6690_v51  ;;  %v3430_v51 = vsel %vm1246_vm1, %v3427_v4, %v3429_v28 }
 0x1eb   : > { %4677 = vmatprep.mubr.f32.mxu1 %v7420_v1 }
 0x1ed   : > { %4998 = vmatmul.mubr.f32.gmra.mrb[26].mxu0 %v7428_v31 }
 0x1ee   : > { %4678 = vmatmul.mubr.f32.gmra.mrb[26].mxu1 %v7429_v42  ;;  %5000 = vmatprep.mubr.f32.mxu0 %v7430_v44 }
 0x1ef   : > { %4680 = vmatprep.mubr.f32.mxu1 %v7431_v60 }
 0x1f1   : > { %5001 = vmatmul.mubr.f32.gmra.mrb[28].mxu0 %v7432_v22 }
 0x1f2   : > { %4681 = vmatmul.mubr.f32.gmra.mrb[28].mxu1 %v7425_v57  ;;  %5003 = vmatprep.mubr.f32.mxu0 %v3428_v52 }
 0x1f3   : > { %4683 = vmatprep.mubr.f32.mxu1 %v6961_v18 }
 0x1f5   : > { %5004 = vmatmul.mubr.f32.gmra.mrb[30].mxu0 %v3430_v51 }
 0x1f6   : > { %4684 = vmatmul.mubr.f32.gmra.mrb[30].mxu1 %v6965_v54 }
 0x26d   : > { %v4560_v25 = vpop.f32.mrb[0].mxu1 }
 0x26e   : > { %v1765_v27 = vpop.f32.mrb[1].mxu1 }
 0x271   : > { %v4563_v39 = vpop.f32.mrb[2].mxu1 }
 0x272   : > { %v1775_v11 = vpop.f32.mrb[3].mxu1 }
 0x275   : > { %v4566_v63 = vpop.f32.mrb[4].mxu1 }
 0x276   : > { %v1785_v59 = vpop.f32.mrb[5].mxu1 }
 0x279   : > { %v4569_v9 = vpop.f32.mrb[6].mxu1 }
 0x27a   : > { %v1795_v32 = vpop.f32.mrb[7].mxu1 }
 0x27d   : > { %v4572_v12 = vpop.f32.mrb[8].mxu1 }
 0x27e   : > { %v1805_v8 = vpop.f32.mrb[9].mxu1 }
 0x281   : > { %v4575_v26 = vpop.f32.mrb[10].mxu1 }
 0x282   : > { %v1815_v41 = vpop.f32.mrb[11].mxu1 }
 0x285   : > { %v4578_v20 = vpop.f32.mrb[12].mxu1 }
 0x286   : > { %v1825_v5 = vpop.f32.mrb[13].mxu1 }
 0x289   : > { %v4581_v19 = vpop.f32.mrb[14].mxu1 }
 0x28a   : > { %v1835_v29 = vpop.f32.mrb[15].mxu1 }
 0x28c   : > { %v4960_v33 = vpop.f32.mrb[0].mxu0 }
 0x28d   : > { %v5310_v30 = vadd.f32 %v4960_v33, %v4560_v25  ;;  %v3499_v49 = vpop.f32.mrb[1].mxu0 }
 0x28e   : > { %v5311_v35 = vadd.f32 %v3499_v49, %v1765_v27 }
 0x28f   : > { %3691 = vst [vmem:[%s7053_s14 + $0x8] sm:$0xff] %v5310_v30 }
 0x290   : > { %3690 = vst [vmem:[%s7053_s14] sm:$0xff] %v5311_v35  ;;  %v4963_v6 = vpop.f32.mrb[2].mxu0 }
 0x291   : > { %v5312_v3 = vadd.f32 %v4963_v6, %v4563_v39  ;;  %v3509_v1 = vpop.f32.mrb[3].mxu0 }
 0x292   : > { %v5313_v13 = vadd.f32 %v3509_v1, %v1775_v11 }
 0x293   : > { %3693 = vst [vmem:[%s7053_s14 + $0x18] sm:$0xff] %v5312_v3 }
 0x294   : > { %3692 = vst [vmem:[%s7053_s14 + $0x10] sm:$0xff] %v5313_v13  ;;  %v4966_v57 = vpop.f32.mrb[4].mxu0 }
 0x295   : > { %v5314_v18 = vadd.f32 %v4966_v57, %v4566_v63  ;;  %v3519_v54 = vpop.f32.mrb[5].mxu0 }
 0x296   : > { %v5315_v21 = vadd.f32 %v3519_v54, %v1785_v59 }
 0x297   : > { %3695 = vst [vmem:[%s7053_s14 + $0x28] sm:$0xff] %v5314_v18 }
 0x298   : > { %3694 = vst [vmem:[%s7053_s14 + $0x20] sm:$0xff] %v5315_v21  ;;  %v4969_v23 = vpop.f32.mrb[6].mxu0 }
 0x299   : > { %v5316_v7 = vadd.f32 %v4969_v23, %v4569_v9  ;;  %v3529_v34 = vpop.f32.mrb[7].mxu0 }
 0x29a   : > { %v5317_v56 = vadd.f32 %v3529_v34, %v1795_v32 }
 0x29b   : > { %3697 = vst [vmem:[%s7053_s14 + $0x38] sm:$0xff] %v5316_v7 }
 0x29c   : > { %3696 = vst [vmem:[%s7053_s14 + $0x30] sm:$0xff] %v5317_v56  ;;  %v4972_v38 = vpop.f32.mrb[8].mxu0 }
 0x29d   : > { %v5318_v0 = vadd.f32 %v4972_v38, %v4572_v12  ;;  %v3539_v10 = vpop.f32.mrb[9].mxu0 }
 0x29e   : > { %v5319_v17 = vadd.f32 %v3539_v10, %v1805_v8 }
 0x29f   : > { %3699 = vst [vmem:[%s7053_s14 + $0x48] sm:$0xff] %v5318_v0 }
 0x2a0   : > { %3698 = vst [vmem:[%s7053_s14 + $0x40] sm:$0xff] %v5319_v17  ;;  %v4975_v37 = vpop.f32.mrb[10].mxu0 }
 0x2a1   : > { %v5320_v58 = vadd.f32 %v4975_v37, %v4575_v26  ;;  %v3549_v43 = vpop.f32.mrb[11].mxu0 }
 0x2a2   : > { %v5321_v45 = vadd.f32 %v3549_v43, %v1815_v41 }
 0x2a3   : > { %3701 = vst [vmem:[%s7053_s14 + $0x58] sm:$0xff] %v5320_v58 }
 0x2a4   : > { %3700 = vst [vmem:[%s7053_s14 + $0x50] sm:$0xff] %v5321_v45  ;;  %v4978_v24 = vpop.f32.mrb[12].mxu0 }
 0x2a5   : > { %v5322_v46 = vadd.f32 %v4978_v24, %v4578_v20  ;;  %v3559_v55 = vpop.f32.mrb[13].mxu0 }
 0x2a6   : > { %v5323_v14 = vadd.f32 %v3559_v55, %v1825_v5 }
 0x2a7   : > { %3703 = vst [vmem:[%s7053_s14 + $0x68] sm:$0xff] %v5322_v46 }
 0x2a8   : > { %3702 = vst [vmem:[%s7053_s14 + $0x60] sm:$0xff] %v5323_v14  ;;  %v4981_v36 = vpop.f32.mrb[14].mxu0 }
 0x2a9   : > { %v5324_v16 = vadd.f32 %v4981_v36, %v4581_v19  ;;  %v3569_v50 = vpop.f32.mrb[15].mxu0 }
 0x2aa   : > { %v5325_v40 = vadd.f32 %v3569_v50, %v1835_v29 }
 0x2ab   : > { %3705 = vst [vmem:[%s7053_s14 + $0x78] sm:$0xff] %v5324_v16 }
 0x2ac   : > { %3704 = vst [vmem:[%s7053_s14 + $0x70] sm:$0xff] %v5325_v40  ;;  %v4984_v48 = vpop.f32.mrb[16].mxu0 }
 0x2ad   : > { %v4664_v15 = vpop.f32.mrb[16].mxu1  ;;  %v3579_v61 = vpop.f32.mrb[17].mxu0 }
 0x2ae   : > { %v5326_v62 = vadd.f32 %v4984_v48, %v4664_v15  ;;  %v2195_v2 = vpop.f32.mrb[17].mxu1 }
 0x2af   : > { %v5327_v53 = vadd.f32 %v3579_v61, %v2195_v2 }
 0x2b0   : > { %3707 = vst [vmem:[%s7053_s14 + $0x88] sm:$0xff] %v5326_v62  ;;  %v4987_v47 = vpop.f32.mrb[18].mxu0 }
 0x2b1   : > { %3706 = vst [vmem:[%s7053_s14 + $0x80] sm:$0xff] %v5327_v53  ;;  %v4667_v4 = vpop.f32.mrb[18].mxu1  ;;  %v3589_v31 = vpop.f32.mrb[19].mxu0 }
 0x2b2   : > { %v5328_v42 = vadd.f32 %v4987_v47, %v4667_v4  ;;  %v2205_v44 = vpop.f32.mrb[19].mxu1 }
 0x2b3   : > { %v5329_v28 = vadd.f32 %v3589_v31, %v2205_v44 }
 0x2b4   : > { %3709 = vst [vmem:[%s7053_s14 + $0x98] sm:$0xff] %v5328_v42  ;;  %v4990_v60 = vpop.f32.mrb[20].mxu0 }
 0x2b5   : > { %3708 = vst [vmem:[%s7053_s14 + $0x90] sm:$0xff] %v5329_v28  ;;  %v4670_v52 = vpop.f32.mrb[20].mxu1  ;;  %v3599_v22 = vpop.f32.mrb[21].mxu0 }
 0x2b6   : > { %v5330_v51 = vadd.f32 %v4990_v60, %v4670_v52  ;;  %v2215_v25 = vpop.f32.mrb[21].mxu1 }
 0x2b7   : > { %v5331_v27 = vadd.f32 %v3599_v22, %v2215_v25 }
 0x2b8   : > { %3711 = vst [vmem:[%s7053_s14 + $0xa8] sm:$0xff] %v5330_v51  ;;  %v4993_v39 = vpop.f32.mrb[22].mxu0 }
 0x2b9   : > { %3710 = vst [vmem:[%s7053_s14 + $0xa0] sm:$0xff] %v5331_v27  ;;  %v4673_v11 = vpop.f32.mrb[22].mxu1  ;;  %v3609_v63 = vpop.f32.mrb[23].mxu0 }
 0x2ba   : > { %v5332_v59 = vadd.f32 %v4993_v39, %v4673_v11  ;;  %v2225_v9 = vpop.f32.mrb[23].mxu1 }
 0x2bb   : > { %v5333_v32 = vadd.f32 %v3609_v63, %v2225_v9 }
 0x2bc   : > { %3713 = vst [vmem:[%s7053_s14 + $0xb8] sm:$0xff] %v5332_v59  ;;  %v4996_v12 = vpop.f32.mrb[24].mxu0 }
 0x2bd   : > { %3712 = vst [vmem:[%s7053_s14 + $0xb0] sm:$0xff] %v5333_v32  ;;  %v4676_v8 = vpop.f32.mrb[24].mxu1  ;;  %v3619_v26 = vpop.f32.mrb[25].mxu0 }
 0x2be   : > { %v5334_v41 = vadd.f32 %v4996_v12, %v4676_v8  ;;  %v2235_v20 = vpop.f32.mrb[25].mxu1 }
 0x2bf   : > { %v5335_v5 = vadd.f32 %v3619_v26, %v2235_v20 }
 0x2c0   : > { %3715 = vst [vmem:[%s7053_s14 + $0xc8] sm:$0xff] %v5334_v41  ;;  %v4999_v19 = vpop.f32.mrb[26].mxu0 }
 0x2c1   : > { %3714 = vst [vmem:[%s7053_s14 + $0xc0] sm:$0xff] %v5335_v5  ;;  %v4679_v29 = vpop.f32.mrb[26].mxu1  ;;  %v3629_v33 = vpop.f32.mrb[27].mxu0 }
 0x2c2   : > { %v5336_v30 = vadd.f32 %v4999_v19, %v4679_v29  ;;  %v2245_v49 = vpop.f32.mrb[27].mxu1 }
 0x2c3   : > { %v5337_v35 = vadd.f32 %v3629_v33, %v2245_v49 }
 0x2c4   : > { %3717 = vst [vmem:[%s7053_s14 + $0xd8] sm:$0xff] %v5336_v30  ;;  %v5002_v6 = vpop.f32.mrb[28].mxu0 }
 0x2c5   : > { %3716 = vst [vmem:[%s7053_s14 + $0xd0] sm:$0xff] %v5337_v35  ;;  %v4682_v3 = vpop.f32.mrb[28].mxu1  ;;  %v3639_v1 = vpop.f32.mrb[29].mxu0 }
 0x2c6   : > { %v5338_v13 = vadd.f32 %v5002_v6, %v4682_v3  ;;  %v2255_v57 = vpop.f32.mrb[29].mxu1 }
 0x2c7   : > { %v5339_v18 = vadd.f32 %v3639_v1, %v2255_v57 }
 0x2c8   : > { %3719 = vst [vmem:[%s7053_s14 + $0xe8] sm:$0xff] %v5338_v13  ;;  %v5005_v54 = vpop.f32.mrb[30].mxu0 }
 0x2c9   : > { %3718 = vst [vmem:[%s7053_s14 + $0xe0] sm:$0xff] %v5339_v18  ;;  %v4685_v21 = vpop.f32.mrb[30].mxu1  ;;  %v3649_v23 = vpop.f32.mrb[31].mxu0 }
 0x2ca   : > { %v5340_v7 = vadd.f32 %v5005_v54, %v4685_v21  ;;  %v2265_v34 = vpop.f32.mrb[31].mxu1 }
 0x2cb   : > { %v5341_v56 = vadd.f32 %v3649_v23, %v2265_v34 }
 0x2cc   : > { %3721 = vst [vmem:[%s7053_s14 + $0xf8] sm:$0xff] %v5340_v7 }
 0x2cd   : > { %3720 = vst [vmem:[%s7053_s14 + $0xf0] sm:$0xff] %v5341_v56 }
 0x2ce   : > { %5670 = shalt.err (!%p5667_p5)
}
 0x2cf   : > { %s5671_s11 = scalar_lea.hbm %s7090_s27, 4096  ;;  %s5675_s24 = scalar_lea.hbm %s7149_s5, 8192 }
 0x2d0   : > { %p5672_p6 = scmp.ne.s32.totalorder %s7090_s27, %s5671_s11  ;;  %p5676_p10 = scmp.lt.u32.totalorder %s7090_s27, %s7149_s5 }
 0x2d1   : > { %p5677_p11 = scmp.lt.u32.totalorder %s5675_s24, %s5671_s11  ;;  %p5679_p13 = scmp.lt.u32.totalorder %s5671_s11, %s7090_s27 }
 0x2d2   : > { %p5673_p7 = pnand %p5672_p6, %p5810_p4 }
 0x2d3   : > { %p5678_p12 = por %p5677_p11, %p5676_p10 }
 0x2d4   : > { %p5674_p9 = pneg %p5673_p7 }
 0x2d5   : > { %p5680_p0 = por %p5679_p13, %p5678_p12 }
 0x2d7   : > { %p5681_p1 = pnand %p5680_p0, %p5674_p9 }
 0x2d9   : > { %5684 = shalt.err (!%p5681_p1)
}
 0x2da   : > { %s5738_s15 = smov 128   ;;  %s5739_s17 = smov 8  }
 0x2db   : > { %5567 = dma.vmem_to_hbm [thread:$0]  (%p5810_p4), %s7092_s16, 4096, %s7090_s27, %s7098_s21, %s5738_s15, %s5738_s15, %s5739_s17  }
 0x2dc PF: > { %p5573_p2 = scmp.ge.s32.totalorder %s5735_s23, 2  ;;  %s3754_s25 = sand.u32 1, %s5715_s18  }
 0x2dd   : > { %s3755_s29 = scalar_lea.sflag [#allocation3], %s3754_s25 }
 0x2de   : > { %p5570_p3 = pnand %p5573_p2, %p5817_p8 }
 0x2e0   : > { %5710 = dma.done.wait (!%p5570_p3), %s3755_s29, 4096  }
 0x2e1   : > { %5712 = vsyncadd (!%p5570_p3), %s3755_s29, 4294963200  ;;  %s18_s23 = sadd.s32 1, %s5735_s23   ;;  %s7433_s18 = smov %s5719_s19 }
 0x2e2   : > { %p15_p5 = scmp.ge.s32.totalorder %s18_s23, 4   ;;  %s7434_s19 = smov %s5723_s20 }
 0x2e3   : > { %s7435_s20 = smov %s5823_s6  ;;  %s7436_s21 = smov %s5731_s22 }
 0x2e4   : > { %s7437_s22 = smov %s7439_s26  ;;  %17 = sbr.rel (!%p15_p5) target bundleno = 4 (0x4), region = 81 }
 0x2eb   :  { %3760 = vsyncpa [#allocation3], 1 }
 0x2ec   :  { %3762 = vsyncpa [#allocation3 + $0x1], 1 }

</bundles_post_ra>
